<compile_context>
chip_gen: v5e
topology: v5e:2x2
jax: 0.10.0
libtpu: 0.0.40
codegen_flags: <defaults>
</compile_context>

<pallas_src>
import functools

import jax
import jax.numpy as jnp
from jax import lax
from jax.experimental import pallas as pl
from jax.experimental.pallas import tpu as pltpu


def _dwconv_kernel(cur_ref, top_ref, bot_ref, w_ref, b_ref, o_ref, *, H):
    # cur_ref: (1, TH, W, C)  current row-strip of the input image
    # top_ref: (1, 1,  W, C)  the single image row just above the strip (clamped)
    # bot_ref: (1, 1,  W, C)  the single image row just below the strip (clamped)
    # w_ref:   (9, C)         depthwise taps, row index = 3*kh + kw
    # b_ref:   (1, C)         bias
    # o_ref:   (1, TH, W, C)  output strip
    TH, W, C = cur_ref.shape[1], cur_ref.shape[2], cur_ref.shape[3]
    f32 = jnp.float32

    s = pl.program_id(1)
    g0 = s * TH                     # global image row of the strip's first row

    # Loop-invariant values, hoisted once per grid step.
    w_all = w_ref[...].astype(f32)                      # (9, C)
    w_rows = tuple(w_all[k:k + 1] for k in range(9))    # 9 x (1, C)
    bias2d = jnp.broadcast_to(b_ref[...].astype(f32), (W, C))
    col = lax.broadcasted_iota(jnp.int32, (W, 1), 0)
    has_left = col >= 1             # position w has a valid w-1 neighbour
    has_right = col <= W - 2        # position w has a valid w+1 neighbour

    def shifted(row):
        # Returns (out[w]=row[w-1], out[w]=row[w+1]), zero-filled at the W edges.
        if W % 8 == 0:
            left = jnp.where(has_left, pltpu.roll(row, 1, 0), 0.0)
            right = jnp.where(has_right, pltpu.roll(row, W - 1, 0), 0.0)
        else:   # fallback for awkward widths: explicit concat instead of roll
            zero_col = jnp.zeros((1, C), f32)
            left = jnp.concatenate([zero_col, row[:W - 1]], axis=0)
            right = jnp.concatenate([row[1:], zero_col], axis=0)
        return left, right

    def triple(row):
        l, r = shifted(row)
        return row, l, r

    def compute(p, c, n):
        # p/c/n are (row, left, right) triples for input rows h-1, h, h+1.
        acc = bias2d + w_rows[4] * c[0]                      # center tap folded in
        acc = acc + w_rows[0] * p[1] + w_rows[1] * p[0] + w_rows[2] * p[2]
        acc = acc + w_rows[3] * c[1] + w_rows[5] * c[2]
        acc = acc + w_rows[6] * n[1] + w_rows[7] * n[0] + w_rows[8] * n[2]
        return acc

    # ---- first output row of the strip (consumes the top halo row) ----
    halo_top = jnp.where(s > 0, top_ref[0, 0].astype(f32), 0.0)
    r0 = cur_ref[0, 0].astype(f32)
    r1 = jnp.where(g0 + 1 < H, cur_ref[0, 1].astype(f32), 0.0)
    t_top, t0, t1 = triple(halo_top), triple(r0), triple(r1)
    o_ref[0, 0] = compute(t_top, t0, t1).astype(o_ref.dtype)

    carry = (*t0, *t1)              # triples of rows (t-1, t) entering t = 1

    # ---- interior rows: sliding 3-row window, shifts computed once per row ----
    if TH > 2:
        def body(t, carry):
            p_r, p_l, p_rr, c_r, c_l, c_rr = carry
            n_raw = cur_ref[0, pl.ds(t + 1, 1)][0].astype(f32)
            n_r = jnp.where(g0 + t + 1 < H, n_raw, 0.0)   # masks padded rows too
            n_l, n_rr = shifted(n_r)
            acc = compute((p_r, p_l, p_rr), (c_r, c_l, c_rr), (n_r, n_l, n_rr))
            o_ref[0, pl.ds(t, 1)] = acc[None].astype(o_ref.dtype)
            return (c_r, c_l, c_rr, n_r, n_l, n_rr)

        carry = lax.fori_loop(1, TH - 1, body, carry,
                              unroll=True if TH <= 18 else 4)

    # ---- last output row of the strip (consumes the bottom halo row) ----
    p_r, p_l, p_rr, c_r, c_l, c_rr = carry
    halo_bot = jnp.where(g0 + TH < H, bot_ref[0, 0].astype(f32), 0.0)
    o_ref[0, TH - 1] = compute((p_r, p_l, p_rr), (c_r, c_l, c_rr),
                               triple(halo_bot)).astype(o_ref.dtype)


def _cdiv(a, b):
    return -(-a // b)


def _pick_strip_rows(B, H, W, C, itemsize, budget):
    """Largest row strip whose input block stays within `budget` bytes, while
    keeping at least 2 grid steps overall (v7x megacore / pipeline depth)."""
    row_bytes = max(1, W * C * itemsize)
    th = min(H, max(2, budget // row_bytes))
    if B * _cdiv(H, th) < 2 and H >= 4:
        th = _cdiv(H, 2)
    return int(th)


def dwconv(x, weight, bias, H, W):
    """Depthwise 3x3 conv matching PyTorch DWConv.forward.

    x: (B, N, C) with N == H*W; weight: (C, 3, 3); bias: (C,). Returns (B, N, C).
    """
    B, N, C = x.shape
    assert N == H * W, "sequence length must equal H*W"
    assert H >= 2 and W >= 2

    # NHWC image view; channels stay UNPADDED (a block dim equal to the full
    # array dim is always legal), avoiding pad/slice HBM passes when C % 128 != 0.
    x_img = x.reshape(B, H, W, C)
    w_taps = jnp.transpose(weight, (1, 2, 0)).reshape(9, C)   # row = 3*kh + kw
    b_row = bias.reshape(1, C)

    itemsize = x.dtype.itemsize
    try:
        vmem_cap = int(pltpu.get_tpu_info().vmem_capacity_bytes)
    except Exception:
        vmem_cap = 64 * 1024 * 1024            # conservative (v7x-sized)
    strip_budget = max(1 << 20, min(vmem_cap // 12, 12 << 20))   # ~5 MiB v7x, ~10 MiB v5e/v6e
    vmem_limit = int(min(vmem_cap * 3 // 4, 96 * 1024 * 1024))   # headroom for scratch

    TH = _pick_strip_rows(B, H, W, C, itemsize, strip_budget)
    n_strips = _cdiv(H, TH)

    # 1-row halo blocks (block size 1 is legal on the H axis — it is not one of
    # the last two dims).  Indices are clamped at the image boundary; the kernel
    # masks those rows to zero there.
    top_map = lambda b, s: (b, jnp.maximum(s * TH - 1, 0), 0, 0)
    bot_map = lambda b, s: (b, jnp.minimum((s + 1) * TH, H - 1), 0, 0)

    flops = 18 * B * H * W * C                 # 9 mul + 9 add per output element
    bytes_accessed = ((2 * B * H * W * C + 2 * B * n_strips * W * C) * itemsize
                      + 10 * C * weight.dtype.itemsize)

    out = pl.pallas_call(
        functools.partial(_dwconv_kernel, H=H),
        out_shape=jax.ShapeDtypeStruct((B, H, W, C), x.dtype),
        grid=(B, n_strips),
        in_specs=[
            pl.BlockSpec((1, TH, W, C), lambda b, s: (b, s, 0, 0)),   # row strip
            pl.BlockSpec((1, 1, W, C), top_map),                      # 1-row top halo
            pl.BlockSpec((1, 1, W, C), bot_map),                      # 1-row bottom halo
            pl.BlockSpec((9, C), lambda b, s: (0, 0)),                # taps
            pl.BlockSpec((1, C), lambda b, s: (0, 0)),                # bias
        ],
        out_specs=pl.BlockSpec((1, TH, W, C), lambda b, s: (b, s, 0, 0)),
        compiler_params=pltpu.CompilerParams(
            dimension_semantics=("parallel", "parallel"),
            vmem_limit_bytes=vmem_limit),
        cost_estimate=pl.CostEstimate(
            flops=int(flops), transcendentals=0,
            bytes_accessed=int(bytes_accessed)),
    )(x_img, x_img, x_img, w_taps, b_row)

    return out.reshape(B, N, C)


def _reference(x, weight, bias, H, W):
    """Pure-JAX reference (same math as torch Conv2d groups=C)."""
    B, N, C = x.shape
    x_nchw = jnp.transpose(x, (0, 2, 1)).reshape(B, C, H, W)
    w = weight[:, None, :, :]  # (C, 1, 3, 3)
    y = jax.lax.conv_general_dilated(
        x_nchw, w, window_strides=(1, 1), padding=((1, 1), (1, 1)),
        dimension_numbers=("NCHW", "OIHW", "NCHW"),
        feature_group_count=C)
    y = y + bias[None, :, None, None]
    return jnp.transpose(y.reshape(B, C, H * W), (0, 2, 1))


if __name__ == "__main__":
    B, C, H, W = 2, 4, 16, 16
    N = H * W

    key = jax.random.PRNGKey(0)
    kx, kw, kb = jax.random.split(key, 3)
    x = jax.random.normal(kx, (B, N, C), dtype=jnp.float32)
    weight = jax.random.normal(kw, (C, 3, 3), dtype=jnp.float32) * 0.1
    bias = jax.random.normal(kb, (C,), dtype=jnp.float32) * 0.1

    out = dwconv(x, weight, bias, H, W)
    out = jax.block_until_ready(out)

    ref = _reference(x, weight, bias, H, W)
    assert out.shape == (B, N, C)
    assert jnp.allclose(out, ref, atol=1e-5, rtol=1e-5), float(
        jnp.max(jnp.abs(out - ref)))

    print("KERNEL_OK")
</pallas_src>

<mosaic_0001>
module attributes {stable_mosaic.version = 11 : i64} {
  func.func @_dwconv_kernel(%arg0: i32, %arg1: i32, %arg2: memref<1x16x16x4xf32, #tpu.memory_space<vmem>>, %arg3: memref<1x1x16x4xf32, #tpu.memory_space<vmem>>, %arg4: memref<1x1x16x4xf32, #tpu.memory_space<vmem>>, %arg5: memref<9x4xf32, #tpu.memory_space<vmem>>, %arg6: memref<1x4xf32, #tpu.memory_space<vmem>>, %arg7: memref<1x16x16x4xf32, #tpu.memory_space<vmem>>) attributes {dimension_semantics = [#tpu.dimension_semantics<parallel>, #tpu.dimension_semantics<parallel>], iteration_bounds = array<i64: 2, 1>, scalar_prefetch = 0 : i64, scratch_operands = 0 : i64, tpu.core_type = #tpu.core_type<tc>, window_params = [{transform_indices = @transform_0, window_bounds = array<i64: 1, 16, 16, 4>}, {transform_indices = @transform_1, window_bounds = array<i64: 1, 1, 16, 4>}, {transform_indices = @transform_2, window_bounds = array<i64: 1, 1, 16, 4>}, {pipeline_mode = #tpu.pipeline_mode<synchronous>, transform_indices = @transform_3, window_bounds = array<i64: 9, 4>}, {pipeline_mode = #tpu.pipeline_mode<synchronous>, transform_indices = @transform_4, window_bounds = array<i64: 1, 4>}, {transform_indices = @transform_5, window_bounds = array<i64: 1, 16, 16, 4>}]} {
    %c16_i32 = arith.constant 16 : i32
    %0 = arith.muli %arg1, %c16_i32 : i32
    %c0 = arith.constant 0 : index
    %c0_0 = arith.constant 0 : index
    %1 = vector.load %arg5[%c0, %c0_0] : memref<9x4xf32, #tpu.memory_space<vmem>>, vector<9x4xf32>
    %2 = vector.extract_strided_slice %1 {offsets = [0, 0], sizes = [1, 4], strides = [1, 1]} : vector<9x4xf32> to vector<1x4xf32>
    %3 = vector.extract_strided_slice %1 {offsets = [1, 0], sizes = [1, 4], strides = [1, 1]} : vector<9x4xf32> to vector<1x4xf32>
    %4 = vector.extract_strided_slice %1 {offsets = [2, 0], sizes = [1, 4], strides = [1, 1]} : vector<9x4xf32> to vector<1x4xf32>
    %5 = vector.extract_strided_slice %1 {offsets = [3, 0], sizes = [1, 4], strides = [1, 1]} : vector<9x4xf32> to vector<1x4xf32>
    %6 = vector.extract_strided_slice %1 {offsets = [4, 0], sizes = [1, 4], strides = [1, 1]} : vector<9x4xf32> to vector<1x4xf32>
    %7 = vector.extract_strided_slice %1 {offsets = [5, 0], sizes = [1, 4], strides = [1, 1]} : vector<9x4xf32> to vector<1x4xf32>
    %8 = vector.extract_strided_slice %1 {offsets = [6, 0], sizes = [1, 4], strides = [1, 1]} : vector<9x4xf32> to vector<1x4xf32>
    %9 = vector.extract_strided_slice %1 {offsets = [7, 0], sizes = [1, 4], strides = [1, 1]} : vector<9x4xf32> to vector<1x4xf32>
    %10 = vector.extract_strided_slice %1 {offsets = [8, 0], sizes = [1, 4], strides = [1, 1]} : vector<9x4xf32> to vector<1x4xf32>
    %c0_1 = arith.constant 0 : index
    %c0_2 = arith.constant 0 : index
    %11 = vector.load %arg6[%c0_1, %c0_2] : memref<1x4xf32, #tpu.memory_space<vmem>>, vector<1x4xf32>
    %12 = vector.shape_cast %11 : vector<1x4xf32> to vector<1x4xf32>
    %13 = vector.broadcast %12 : vector<1x4xf32> to vector<16x4xf32>
    %14 = tpu.iota {dimensions = array<i32: 0>} : vector<16x1xi32>
    %c1_i32 = arith.constant 1 : i32
    %15 = vector.broadcast %c1_i32 : i32 to vector<16x1xi32>
    %16 = arith.cmpi sge, %14, %15 : vector<16x1xi32>
    %c14_i32 = arith.constant 14 : i32
    %17 = vector.broadcast %c14_i32 : i32 to vector<16x1xi32>
    %18 = arith.cmpi sle, %14, %17 : vector<16x1xi32>
    %c0_i32 = arith.constant 0 : i32
    %19 = arith.cmpi sgt, %arg1, %c0_i32 : i32
    %c0_3 = arith.constant 0 : index
    %c0_4 = arith.constant 0 : index
    %c0_5 = arith.constant 0 : index
    %c0_6 = arith.constant 0 : index
    %20 = vector.load %arg3[%c0_3, %c0_4, %c0_5, %c0_6] : memref<1x1x16x4xf32, #tpu.memory_space<vmem>>, vector<1x1x16x4xf32>
    %21 = vector.shape_cast %20 : vector<1x1x16x4xf32> to vector<16x4xf32>
    %cst = arith.constant 0.000000e+00 : f32
    %22 = vector.broadcast %cst : f32 to vector<16x4xf32>
    %23 = arith.select %19, %21, %22 : vector<16x4xf32>
    %c0_7 = arith.constant 0 : index
    %c0_8 = arith.constant 0 : index
    %c0_9 = arith.constant 0 : index
    %c0_10 = arith.constant 0 : index
    %24 = vector.load %arg2[%c0_7, %c0_8, %c0_9, %c0_10] : memref<1x16x16x4xf32, #tpu.memory_space<vmem>>, vector<1x1x16x4xf32>
    %25 = vector.shape_cast %24 : vector<1x1x16x4xf32> to vector<16x4xf32>
    %c1_i32_11 = arith.constant 1 : i32
    %26 = arith.addi %0, %c1_i32_11 : i32
    %c16_i32_12 = arith.constant 16 : i32
    %27 = arith.cmpi slt, %26, %c16_i32_12 : i32
    %c0_13 = arith.constant 0 : index
    %c1 = arith.constant 1 : index
    %c0_14 = arith.constant 0 : index
    %c0_15 = arith.constant 0 : index
    %28 = vector.load %arg2[%c0_13, %c1, %c0_14, %c0_15] : memref<1x16x16x4xf32, #tpu.memory_space<vmem>>, vector<1x1x16x4xf32>
    %29 = vector.shape_cast %28 : vector<1x1x16x4xf32> to vector<16x4xf32>
    %cst_16 = arith.constant 0.000000e+00 : f32
    %30 = vector.broadcast %cst_16 : f32 to vector<16x4xf32>
    %31 = arith.select %27, %29, %30 : vector<16x4xf32>
    %c1_i32_17 = arith.constant 1 : i32
    %32 = tpu.dynamic_rotate %23 by %c1_i32_17 dim 0 : vector<16x4xf32>, i32 -> vector<16x4xf32>
    %cst_18 = arith.constant 0.000000e+00 : f32
    %33 = vector.shape_cast %16 : vector<16x1xi1> to vector<16x1xi1>
    %34 = vector.broadcast %33 : vector<16x1xi1> to vector<16x4xi1>
    %35 = vector.broadcast %cst_18 : f32 to vector<16x4xf32>
    %36 = arith.select %34, %32, %35 : vector<16x4xi1>, vector<16x4xf32>
    %c15_i32 = arith.constant 15 : i32
    %37 = tpu.dynamic_rotate %23 by %c15_i32 dim 0 : vector<16x4xf32>, i32 -> vector<16x4xf32>
    %cst_19 = arith.constant 0.000000e+00 : f32
    %38 = vector.shape_cast %18 : vector<16x1xi1> to vector<16x1xi1>
    %39 = vector.broadcast %38 : vector<16x1xi1> to vector<16x4xi1>
    %40 = vector.broadcast %cst_19 : f32 to vector<16x4xf32>
    %41 = arith.select %39, %37, %40 : vector<16x4xi1>, vector<16x4xf32>
    %c1_i32_20 = arith.constant 1 : i32
    %42 = tpu.dynamic_rotate %25 by %c1_i32_20 dim 0 : vector<16x4xf32>, i32 -> vector<16x4xf32>
    %cst_21 = arith.constant 0.000000e+00 : f32
    %43 = vector.shape_cast %16 : vector<16x1xi1> to vector<16x1xi1>
    %44 = vector.broadcast %43 : vector<16x1xi1> to vector<16x4xi1>
    %45 = vector.broadcast %cst_21 : f32 to vector<16x4xf32>
    %46 = arith.select %44, %42, %45 : vector<16x4xi1>, vector<16x4xf32>
    %c15_i32_22 = arith.constant 15 : i32
    %47 = tpu.dynamic_rotate %25 by %c15_i32_22 dim 0 : vector<16x4xf32>, i32 -> vector<16x4xf32>
    %cst_23 = arith.constant 0.000000e+00 : f32
    %48 = vector.shape_cast %18 : vector<16x1xi1> to vector<16x1xi1>
    %49 = vector.broadcast %48 : vector<16x1xi1> to vector<16x4xi1>
    %50 = vector.broadcast %cst_23 : f32 to vector<16x4xf32>
    %51 = arith.select %49, %47, %50 : vector<16x4xi1>, vector<16x4xf32>
    %c1_i32_24 = arith.constant 1 : i32
    %52 = tpu.dynamic_rotate %31 by %c1_i32_24 dim 0 : vector<16x4xf32>, i32 -> vector<16x4xf32>
    %cst_25 = arith.constant 0.000000e+00 : f32
    %53 = vector.shape_cast %16 : vector<16x1xi1> to vector<16x1xi1>
    %54 = vector.broadcast %53 : vector<16x1xi1> to vector<16x4xi1>
    %55 = vector.broadcast %cst_25 : f32 to vector<16x4xf32>
    %56 = arith.select %54, %52, %55 : vector<16x4xi1>, vector<16x4xf32>
    %c15_i32_26 = arith.constant 15 : i32
    %57 = tpu.dynamic_rotate %31 by %c15_i32_26 dim 0 : vector<16x4xf32>, i32 -> vector<16x4xf32>
    %cst_27 = arith.constant 0.000000e+00 : f32
    %58 = vector.shape_cast %18 : vector<16x1xi1> to vector<16x1xi1>
    %59 = vector.broadcast %58 : vector<16x1xi1> to vector<16x4xi1>
    %60 = vector.broadcast %cst_27 : f32 to vector<16x4xf32>
    %61 = arith.select %59, %57, %60 : vector<16x4xi1>, vector<16x4xf32>
    %62 = vector.broadcast %6 : vector<1x4xf32> to vector<16x4xf32>
    %63 = arith.mulf %62, %25 : vector<16x4xf32>
    %64 = arith.addf %13, %63 : vector<16x4xf32>
    %65 = vector.broadcast %2 : vector<1x4xf32> to vector<16x4xf32>
    %66 = arith.mulf %65, %36 : vector<16x4xf32>
    %67 = arith.addf %64, %66 : vector<16x4xf32>
    %68 = vector.broadcast %3 : vector<1x4xf32> to vector<16x4xf32>
    %69 = arith.mulf %68, %23 : vector<16x4xf32>
    %70 = arith.addf %67, %69 : vector<16x4xf32>
    %71 = vector.broadcast %4 : vector<1x4xf32> to vector<16x4xf32>
    %72 = arith.mulf %71, %41 : vector<16x4xf32>
    %73 = arith.addf %70, %72 : vector<16x4xf32>
    %74 = vector.broadcast %5 : vector<1x4xf32> to vector<16x4xf32>
    %75 = arith.mulf %74, %46 : vector<16x4xf32>
    %76 = arith.addf %73, %75 : vector<16x4xf32>
    %77 = vector.broadcast %7 : vector<1x4xf32> to vector<16x4xf32>
    %78 = arith.mulf %77, %51 : vector<16x4xf32>
    %79 = arith.addf %76, %78 : vector<16x4xf32>
    %80 = vector.broadcast %8 : vector<1x4xf32> to vector<16x4xf32>
    %81 = arith.mulf %80, %56 : vector<16x4xf32>
    %82 = arith.addf %79, %81 : vector<16x4xf32>
    %83 = vector.broadcast %9 : vector<1x4xf32> to vector<16x4xf32>
    %84 = arith.mulf %83, %31 : vector<16x4xf32>
    %85 = arith.addf %82, %84 : vector<16x4xf32>
    %86 = vector.broadcast %10 : vector<1x4xf32> to vector<16x4xf32>
    %87 = arith.mulf %86, %61 : vector<16x4xf32>
    %88 = arith.addf %85, %87 : vector<16x4xf32>
    %c0_28 = arith.constant 0 : index
    %c0_29 = arith.constant 0 : index
    %c0_30 = arith.constant 0 : index
    %c0_31 = arith.constant 0 : index
    %89 = vector.load %arg7[%c0_28, %c0_29, %c0_30, %c0_31] : memref<1x16x16x4xf32, #tpu.memory_space<vmem>>, vector<1x1x16x4xf32>
    %90 = vector.shape_cast %89 : vector<1x1x16x4xf32> to vector<16x4xf32>
    %91 = vector.shape_cast %88 : vector<16x4xf32> to vector<1x1x16x4xf32>
    tpu.vector_store %arg7[%c0_28, %c0_29, %c0_30, %c0_31], %91 {strides = array<i32>} : memref<1x16x16x4xf32, #tpu.memory_space<vmem>>, vector<1x1x16x4xf32>,
    %c1_i32_32 = arith.constant 1 : i32
    %c1_i32_33 = arith.constant 1 : i32
    %92 = arith.addi %c1_i32_32, %c1_i32_33 : i32
    %c0_34 = arith.constant 0 : index
    %93 = arith.index_cast %92 : i32 to index
    %c0_35 = arith.constant 0 : index
    %c0_36 = arith.constant 0 : index
    %94 = vector.load %arg2[%c0_34, %93, %c0_35, %c0_36] : memref<1x16x16x4xf32, #tpu.memory_space<vmem>>, vector<1x1x16x4xf32>
    %95 = vector.shape_cast %94 : vector<1x1x16x4xf32> to vector<1x16x4xf32>
    %96 = vector.shape_cast %95 : vector<1x16x4xf32> to vector<16x4xf32>
    %97 = arith.addi %0, %c1_i32_32 : i32
    %c1_i32_37 = arith.constant 1 : i32
    %98 = arith.addi %97, %c1_i32_37 : i32
    %c16_i32_38 = arith.constant 16 : i32
    %99 = arith.cmpi slt, %98, %c16_i32_38 : i32
    %cst_39 = arith.constant 0.000000e+00 : f32
    %100 = vector.broadcast %cst_39 : f32 to vector<16x4xf32>
    %101 = arith.select %99, %96, %100 : vector<16x4xf32>
    %c1_i32_40 = arith.constant 1 : i32
    %102 = tpu.dynamic_rotate %101 by %c1_i32_40 dim 0 : vector<16x4xf32>, i32 -> vector<16x4xf32>
    %cst_41 = arith.constant 0.000000e+00 : f32
    %103 = vector.shape_cast %16 : vector<16x1xi1> to vector<16x1xi1>
    %104 = vector.broadcast %103 : vector<16x1xi1> to vector<16x4xi1>
    %105 = vector.broadcast %cst_41 : f32 to vector<16x4xf32>
    %106 = arith.select %104, %102, %105 : vector<16x4xi1>, vector<16x4xf32>
    %c15_i32_42 = arith.constant 15 : i32
    %107 = tpu.dynamic_rotate %101 by %c15_i32_42 dim 0 : vector<16x4xf32>, i32 -> vector<16x4xf32>
    %cst_43 = arith.constant 0.000000e+00 : f32
    %108 = vector.shape_cast %18 : vector<16x1xi1> to vector<16x1xi1>
    %109 = vector.broadcast %108 : vector<16x1xi1> to vector<16x4xi1>
    %110 = vector.broadcast %cst_43 : f32 to vector<16x4xf32>
    %111 = arith.select %109, %107, %110 : vector<16x4xi1>, vector<16x4xf32>
    %112 = vector.broadcast %6 : vector<1x4xf32> to vector<16x4xf32>
    %113 = arith.mulf %112, %31 : vector<16x4xf32>
    %114 = arith.addf %13, %113 : vector<16x4xf32>
    %115 = vector.broadcast %2 : vector<1x4xf32> to vector<16x4xf32>
    %116 = arith.mulf %115, %46 : vector<16x4xf32>
    %117 = arith.addf %114, %116 : vector<16x4xf32>
    %118 = vector.broadcast %3 : vector<1x4xf32> to vector<16x4xf32>
    %119 = arith.mulf %118, %25 : vector<16x4xf32>
    %120 = arith.addf %117, %119 : vector<16x4xf32>
    %121 = vector.broadcast %4 : vector<1x4xf32> to vector<16x4xf32>
    %122 = arith.mulf %121, %51 : vector<16x4xf32>
    %123 = arith.addf %120, %122 : vector<16x4xf32>
    %124 = vector.broadcast %5 : vector<1x4xf32> to vector<16x4xf32>
    %125 = arith.mulf %124, %56 : vector<16x4xf32>
    %126 = arith.addf %123, %125 : vector<16x4xf32>
    %127 = vector.broadcast %7 : vector<1x4xf32> to vector<16x4xf32>
    %128 = arith.mulf %127, %61 : vector<16x4xf32>
    %129 = arith.addf %126, %128 : vector<16x4xf32>
    %130 = vector.broadcast %8 : vector<1x4xf32> to vector<16x4xf32>
    %131 = arith.mulf %130, %106 : vector<16x4xf32>
    %132 = arith.addf %129, %131 : vector<16x4xf32>
    %133 = vector.broadcast %9 : vector<1x4xf32> to vector<16x4xf32>
    %134 = arith.mulf %133, %101 : vector<16x4xf32>
    %135 = arith.addf %132, %134 : vector<16x4xf32>
    %136 = vector.broadcast %10 : vector<1x4xf32> to vector<16x4xf32>
    %137 = arith.mulf %136, %111 : vector<16x4xf32>
    %138 = arith.addf %135, %137 : vector<16x4xf32>
    %139 = vector.shape_cast %138 : vector<16x4xf32> to vector<1x16x4xf32>
    %c0_44 = arith.constant 0 : index
    %140 = arith.index_cast %c1_i32_32 : i32 to index
    %c0_45 = arith.constant 0 : index
    %c0_46 = arith.constant 0 : index
    %141 = vector.load %arg7[%c0_44, %140, %c0_45, %c0_46] : memref<1x16x16x4xf32, #tpu.memory_space<vmem>>, vector<1x1x16x4xf32>
    %142 = vector.shape_cast %141 : vector<1x1x16x4xf32> to vector<1x16x4xf32>
    %143 = vector.shape_cast %139 : vector<1x16x4xf32> to vector<1x1x16x4xf32>
    tpu.vector_store %arg7[%c0_44, %140, %c0_45, %c0_46], %143 {strides = array<i32>} : memref<1x16x16x4xf32, #tpu.memory_space<vmem>>, vector<1x1x16x4xf32>,
    %c2_i32 = arith.constant 2 : i32
    %c1_i32_47 = arith.constant 1 : i32
    %144 = arith.addi %c2_i32, %c1_i32_47 : i32
    %c0_48 = arith.constant 0 : index
    %145 = arith.index_cast %144 : i32 to index
    %c0_49 = arith.constant 0 : index
    %c0_50 = arith.constant 0 : index
    %146 = vector.load %arg2[%c0_48, %145, %c0_49, %c0_50] : memref<1x16x16x4xf32, #tpu.memory_space<vmem>>, vector<1x1x16x4xf32>
    %147 = vector.shape_cast %146 : vector<1x1x16x4xf32> to vector<1x16x4xf32>
    %148 = vector.shape_cast %147 : vector<1x16x4xf32> to vector<16x4xf32>
    %149 = arith.addi %0, %c2_i32 : i32
    %c1_i32_51 = arith.constant 1 : i32
    %150 = arith.addi %149, %c1_i32_51 : i32
    %c16_i32_52 = arith.constant 16 : i32
    %151 = arith.cmpi slt, %150, %c16_i32_52 : i32
    %cst_53 = arith.constant 0.000000e+00 : f32
    %152 = vector.broadcast %cst_53 : f32 to vector<16x4xf32>
    %153 = arith.select %151, %148, %152 : vector<16x4xf32>
    %c1_i32_54 = arith.constant 1 : i32
    %154 = tpu.dynamic_rotate %153 by %c1_i32_54 dim 0 : vector<16x4xf32>, i32 -> vector<16x4xf32>
    %cst_55 = arith.constant 0.000000e+00 : f32
    %155 = vector.shape_cast %16 : vector<16x1xi1> to vector<16x1xi1>
    %156 = vector.broadcast %155 : vector<16x1xi1> to vector<16x4xi1>
    %157 = vector.broadcast %cst_55 : f32 to vector<16x4xf32>
    %158 = arith.select %156, %154, %157 : vector<16x4xi1>, vector<16x4xf32>
    %c15_i32_56 = arith.constant 15 : i32
    %159 = tpu.dynamic_rotate %153 by %c15_i32_56 dim 0 : vector<16x4xf32>, i32 -> vector<16x4xf32>
    %cst_57 = arith.constant 0.000000e+00 : f32
    %160 = vector.shape_cast %18 : vector<16x1xi1> to vector<16x1xi1>
    %161 = vector.broadcast %160 : vector<16x1xi1> to vector<16x4xi1>
    %162 = vector.broadcast %cst_57 : f32 to vector<16x4xf32>
    %163 = arith.select %161, %159, %162 : vector<16x4xi1>, vector<16x4xf32>
    %164 = vector.broadcast %6 : vector<1x4xf32> to vector<16x4xf32>
    %165 = arith.mulf %164, %101 : vector<16x4xf32>
    %166 = arith.addf %13, %165 : vector<16x4xf32>
    %167 = vector.broadcast %2 : vector<1x4xf32> to vector<16x4xf32>
    %168 = arith.mulf %167, %56 : vector<16x4xf32>
    %169 = arith.addf %166, %168 : vector<16x4xf32>
    %170 = vector.broadcast %3 : vector<1x4xf32> to vector<16x4xf32>
    %171 = arith.mulf %170, %31 : vector<16x4xf32>
    %172 = arith.addf %169, %171 : vector<16x4xf32>
    %173 = vector.broadcast %4 : vector<1x4xf32> to vector<16x4xf32>
    %174 = arith.mulf %173, %61 : vector<16x4xf32>
    %175 = arith.addf %172, %174 : vector<16x4xf32>
    %176 = vector.broadcast %5 : vector<1x4xf32> to vector<16x4xf32>
    %177 = arith.mulf %176, %106 : vector<16x4xf32>
    %178 = arith.addf %175, %177 : vector<16x4xf32>
    %179 = vector.broadcast %7 : vector<1x4xf32> to vector<16x4xf32>
    %180 = arith.mulf %179, %111 : vector<16x4xf32>
    %181 = arith.addf %178, %180 : vector<16x4xf32>
    %182 = vector.broadcast %8 : vector<1x4xf32> to vector<16x4xf32>
    %183 = arith.mulf %182, %158 : vector<16x4xf32>
    %184 = arith.addf %181, %183 : vector<16x4xf32>
    %185 = vector.broadcast %9 : vector<1x4xf32> to vector<16x4xf32>
    %186 = arith.mulf %185, %153 : vector<16x4xf32>
    %187 = arith.addf %184, %186 : vector<16x4xf32>
    %188 = vector.broadcast %10 : vector<1x4xf32> to vector<16x4xf32>
    %189 = arith.mulf %188, %163 : vector<16x4xf32>
    %190 = arith.addf %187, %189 : vector<16x4xf32>
    %191 = vector.shape_cast %190 : vector<16x4xf32> to vector<1x16x4xf32>
    %c0_58 = arith.constant 0 : index
    %192 = arith.index_cast %c2_i32 : i32 to index
    %c0_59 = arith.constant 0 : index
    %c0_60 = arith.constant 0 : index
    %193 = vector.load %arg7[%c0_58, %192, %c0_59, %c0_60] : memref<1x16x16x4xf32, #tpu.memory_space<vmem>>, vector<1x1x16x4xf32>
    %194 = vector.shape_cast %193 : vector<1x1x16x4xf32> to vector<1x16x4xf32>
    %195 = vector.shape_cast %191 : vector<1x16x4xf32> to vector<1x1x16x4xf32>
    tpu.vector_store %arg7[%c0_58, %192, %c0_59, %c0_60], %195 {strides = array<i32>} : memref<1x16x16x4xf32, #tpu.memory_space<vmem>>, vector<1x1x16x4xf32>,
    %c3_i32 = arith.constant 3 : i32
    %c1_i32_61 = arith.constant 1 : i32
    %196 = arith.addi %c3_i32, %c1_i32_61 : i32
    %c0_62 = arith.constant 0 : index
    %197 = arith.index_cast %196 : i32 to index
    %c0_63 = arith.constant 0 : index
    %c0_64 = arith.constant 0 : index
    %198 = vector.load %arg2[%c0_62, %197, %c0_63, %c0_64] : memref<1x16x16x4xf32, #tpu.memory_space<vmem>>, vector<1x1x16x4xf32>
    %199 = vector.shape_cast %198 : vector<1x1x16x4xf32> to vector<1x16x4xf32>
    %200 = vector.shape_cast %199 : vector<1x16x4xf32> to vector<16x4xf32>
    %201 = arith.addi %0, %c3_i32 : i32
    %c1_i32_65 = arith.constant 1 : i32
    %202 = arith.addi %201, %c1_i32_65 : i32
    %c16_i32_66 = arith.constant 16 : i32
    %203 = arith.cmpi slt, %202, %c16_i32_66 : i32
    %cst_67 = arith.constant 0.000000e+00 : f32
    %204 = vector.broadcast %cst_67 : f32 to vector<16x4xf32>
    %205 = arith.select %203, %200, %204 : vector<16x4xf32>
    %c1_i32_68 = arith.constant 1 : i32
    %206 = tpu.dynamic_rotate %205 by %c1_i32_68 dim 0 : vector<16x4xf32>, i32 -> vector<16x4xf32>
    %cst_69 = arith.constant 0.000000e+00 : f32
    %207 = vector.shape_cast %16 : vector<16x1xi1> to vector<16x1xi1>
    %208 = vector.broadcast %207 : vector<16x1xi1> to vector<16x4xi1>
    %209 = vector.broadcast %cst_69 : f32 to vector<16x4xf32>
    %210 = arith.select %208, %206, %209 : vector<16x4xi1>, vector<16x4xf32>
    %c15_i32_70 = arith.constant 15 : i32
    %211 = tpu.dynamic_rotate %205 by %c15_i32_70 dim 0 : vector<16x4xf32>, i32 -> vector<16x4xf32>
    %cst_71 = arith.constant 0.000000e+00 : f32
    %212 = vector.shape_cast %18 : vector<16x1xi1> to vector<16x1xi1>
    %213 = vector.broadcast %212 : vector<16x1xi1> to vector<16x4xi1>
    %214 = vector.broadcast %cst_71 : f32 to vector<16x4xf32>
    %215 = arith.select %213, %211, %214 : vector<16x4xi1>, vector<16x4xf32>
    %216 = vector.broadcast %6 : vector<1x4xf32> to vector<16x4xf32>
    %217 = arith.mulf %216, %153 : vector<16x4xf32>
    %218 = arith.addf %13, %217 : vector<16x4xf32>
    %219 = vector.broadcast %2 : vector<1x4xf32> to vector<16x4xf32>
    %220 = arith.mulf %219, %106 : vector<16x4xf32>
    %221 = arith.addf %218, %220 : vector<16x4xf32>
    %222 = vector.broadcast %3 : vector<1x4xf32> to vector<16x4xf32>
    %223 = arith.mulf %222, %101 : vector<16x4xf32>
    %224 = arith.addf %221, %223 : vector<16x4xf32>
    %225 = vector.broadcast %4 : vector<1x4xf32> to vector<16x4xf32>
    %226 = arith.mulf %225, %111 : vector<16x4xf32>
    %227 = arith.addf %224, %226 : vector<16x4xf32>
    %228 = vector.broadcast %5 : vector<1x4xf32> to vector<16x4xf32>
    %229 = arith.mulf %228, %158 : vector<16x4xf32>
    %230 = arith.addf %227, %229 : vector<16x4xf32>
    %231 = vector.broadcast %7 : vector<1x4xf32> to vector<16x4xf32>
    %232 = arith.mulf %231, %163 : vector<16x4xf32>
    %233 = arith.addf %230, %232 : vector<16x4xf32>
    %234 = vector.broadcast %8 : vector<1x4xf32> to vector<16x4xf32>
    %235 = arith.mulf %234, %210 : vector<16x4xf32>
    %236 = arith.addf %233, %235 : vector<16x4xf32>
    %237 = vector.broadcast %9 : vector<1x4xf32> to vector<16x4xf32>
    %238 = arith.mulf %237, %205 : vector<16x4xf32>
    %239 = arith.addf %236, %238 : vector<16x4xf32>
    %240 = vector.broadcast %10 : vector<1x4xf32> to vector<16x4xf32>
    %241 = arith.mulf %240, %215 : vector<16x4xf32>
    %242 = arith.addf %239, %241 : vector<16x4xf32>
    %243 = vector.shape_cast %242 : vector<16x4xf32> to vector<1x16x4xf32>
    %c0_72 = arith.constant 0 : index
    %244 = arith.index_cast %c3_i32 : i32 to index
    %c0_73 = arith.constant 0 : index
    %c0_74 = arith.constant 0 : index
    %245 = vector.load %arg7[%c0_72, %244, %c0_73, %c0_74] : memref<1x16x16x4xf32, #tpu.memory_space<vmem>>, vector<1x1x16x4xf32>
    %246 = vector.shape_cast %245 : vector<1x1x16x4xf32> to vector<1x16x4xf32>
    %247 = vector.shape_cast %243 : vector<1x16x4xf32> to vector<1x1x16x4xf32>
    tpu.vector_store %arg7[%c0_72, %244, %c0_73, %c0_74], %247 {strides = array<i32>} : memref<1x16x16x4xf32, #tpu.memory_space<vmem>>, vector<1x1x16x4xf32>,
    %c4_i32 = arith.constant 4 : i32
    %c1_i32_75 = arith.constant 1 : i32
    %248 = arith.addi %c4_i32, %c1_i32_75 : i32
    %c0_76 = arith.constant 0 : index
    %249 = arith.index_cast %248 : i32 to index
    %c0_77 = arith.constant 0 : index
    %c0_78 = arith.constant 0 : index
    %250 = vector.load %arg2[%c0_76, %249, %c0_77, %c0_78] : memref<1x16x16x4xf32, #tpu.memory_space<vmem>>, vector<1x1x16x4xf32>
    %251 = vector.shape_cast %250 : vector<1x1x16x4xf32> to vector<1x16x4xf32>
    %252 = vector.shape_cast %251 : vector<1x16x4xf32> to vector<16x4xf32>
    %253 = arith.addi %0, %c4_i32 : i32
    %c1_i32_79 = arith.constant 1 : i32
    %254 = arith.addi %253, %c1_i32_79 : i32
    %c16_i32_80 = arith.constant 16 : i32
    %255 = arith.cmpi slt, %254, %c16_i32_80 : i32
    %cst_81 = arith.constant 0.000000e+00 : f32
    %256 = vector.broadcast %cst_81 : f32 to vector<16x4xf32>
    %257 = arith.select %255, %252, %256 : vector<16x4xf32>
    %c1_i32_82 = arith.constant 1 : i32
    %258 = tpu.dynamic_rotate %257 by %c1_i32_82 dim 0 : vector<16x4xf32>, i32 -> vector<16x4xf32>
    %cst_83 = arith.constant 0.000000e+00 : f32
    %259 = vector.shape_cast %16 : vector<16x1xi1> to vector<16x1xi1>
    %260 = vector.broadcast %259 : vector<16x1xi1> to vector<16x4xi1>
    %261 = vector.broadcast %cst_83 : f32 to vector<16x4xf32>
    %262 = arith.select %260, %258, %261 : vector<16x4xi1>, vector<16x4xf32>
    %c15_i32_84 = arith.constant 15 : i32
    %263 = tpu.dynamic_rotate %257 by %c15_i32_84 dim 0 : vector<16x4xf32>, i32 -> vector<16x4xf32>
    %cst_85 = arith.constant 0.000000e+00 : f32
    %264 = vector.shape_cast %18 : vector<16x1xi1> to vector<16x1xi1>
    %265 = vector.broadcast %264 : vector<16x1xi1> to vector<16x4xi1>
    %266 = vector.broadcast %cst_85 : f32 to vector<16x4xf32>
    %267 = arith.select %265, %263, %266 : vector<16x4xi1>, vector<16x4xf32>
    %268 = vector.broadcast %6 : vector<1x4xf32> to vector<16x4xf32>
    %269 = arith.mulf %268, %205 : vector<16x4xf32>
    %270 = arith.addf %13, %269 : vector<16x4xf32>
    %271 = vector.broadcast %2 : vector<1x4xf32> to vector<16x4xf32>
    %272 = arith.mulf %271, %158 : vector<16x4xf32>
    %273 = arith.addf %270, %272 : vector<16x4xf32>
    %274 = vector.broadcast %3 : vector<1x4xf32> to vector<16x4xf32>
    %275 = arith.mulf %274, %153 : vector<16x4xf32>
    %276 = arith.addf %273, %275 : vector<16x4xf32>
    %277 = vector.broadcast %4 : vector<1x4xf32> to vector<16x4xf32>
    %278 = arith.mulf %277, %163 : vector<16x4xf32>
    %279 = arith.addf %276, %278 : vector<16x4xf32>
    %280 = vector.broadcast %5 : vector<1x4xf32> to vector<16x4xf32>
    %281 = arith.mulf %280, %210 : vector<16x4xf32>
    %282 = arith.addf %279, %281 : vector<16x4xf32>
    %283 = vector.broadcast %7 : vector<1x4xf32> to vector<16x4xf32>
    %284 = arith.mulf %283, %215 : vector<16x4xf32>
    %285 = arith.addf %282, %284 : vector<16x4xf32>
    %286 = vector.broadcast %8 : vector<1x4xf32> to vector<16x4xf32>
    %287 = arith.mulf %286, %262 : vector<16x4xf32>
    %288 = arith.addf %285, %287 : vector<16x4xf32>
    %289 = vector.broadcast %9 : vector<1x4xf32> to vector<16x4xf32>
    %290 = arith.mulf %289, %257 : vector<16x4xf32>
    %291 = arith.addf %288, %290 : vector<16x4xf32>
    %292 = vector.broadcast %10 : vector<1x4xf32> to vector<16x4xf32>
    %293 = arith.mulf %292, %267 : vector<16x4xf32>
    %294 = arith.addf %291, %293 : vector<16x4xf32>
    %295 = vector.shape_cast %294 : vector<16x4xf32> to vector<1x16x4xf32>
    %c0_86 = arith.constant 0 : index
    %296 = arith.index_cast %c4_i32 : i32 to index
    %c0_87 = arith.constant 0 : index
    %c0_88 = arith.constant 0 : index
    %297 = vector.load %arg7[%c0_86, %296, %c0_87, %c0_88] : memref<1x16x16x4xf32, #tpu.memory_space<vmem>>, vector<1x1x16x4xf32>
    %298 = vector.shape_cast %297 : vector<1x1x16x4xf32> to vector<1x16x4xf32>
    %299 = vector.shape_cast %295 : vector<1x16x4xf32> to vector<1x1x16x4xf32>
    tpu.vector_store %arg7[%c0_86, %296, %c0_87, %c0_88], %299 {strides = array<i32>} : memref<1x16x16x4xf32, #tpu.memory_space<vmem>>, vector<1x1x16x4xf32>,
    %c5_i32 = arith.constant 5 : i32
    %c1_i32_89 = arith.constant 1 : i32
    %300 = arith.addi %c5_i32, %c1_i32_89 : i32
    %c0_90 = arith.constant 0 : index
    %301 = arith.index_cast %300 : i32 to index
    %c0_91 = arith.constant 0 : index
    %c0_92 = arith.constant 0 : index
    %302 = vector.load %arg2[%c0_90, %301, %c0_91, %c0_92] : memref<1x16x16x4xf32, #tpu.memory_space<vmem>>, vector<1x1x16x4xf32>
    %303 = vector.shape_cast %302 : vector<1x1x16x4xf32> to vector<1x16x4xf32>
    %304 = vector.shape_cast %303 : vector<1x16x4xf32> to vector<16x4xf32>
    %305 = arith.addi %0, %c5_i32 : i32
    %c1_i32_93 = arith.constant 1 : i32
    %306 = arith.addi %305, %c1_i32_93 : i32
    %c16_i32_94 = arith.constant 16 : i32
    %307 = arith.cmpi slt, %306, %c16_i32_94 : i32
    %cst_95 = arith.constant 0.000000e+00 : f32
    %308 = vector.broadcast %cst_95 : f32 to vector<16x4xf32>
    %309 = arith.select %307, %304, %308 : vector<16x4xf32>
    %c1_i32_96 = arith.constant 1 : i32
    %310 = tpu.dynamic_rotate %309 by %c1_i32_96 dim 0 : vector<16x4xf32>, i32 -> vector<16x4xf32>
    %cst_97 = arith.constant 0.000000e+00 : f32
    %311 = vector.shape_cast %16 : vector<16x1xi1> to vector<16x1xi1>
    %312 = vector.broadcast %311 : vector<16x1xi1> to vector<16x4xi1>
    %313 = vector.broadcast %cst_97 : f32 to vector<16x4xf32>
    %314 = arith.select %312, %310, %313 : vector<16x4xi1>, vector<16x4xf32>
    %c15_i32_98 = arith.constant 15 : i32
    %315 = tpu.dynamic_rotate %309 by %c15_i32_98 dim 0 : vector<16x4xf32>, i32 -> vector<16x4xf32>
    %cst_99 = arith.constant 0.000000e+00 : f32
    %316 = vector.shape_cast %18 : vector<16x1xi1> to vector<16x1xi1>
    %317 = vector.broadcast %316 : vector<16x1xi1> to vector<16x4xi1>
    %318 = vector.broadcast %cst_99 : f32 to vector<16x4xf32>
    %319 = arith.select %317, %315, %318 : vector<16x4xi1>, vector<16x4xf32>
    %320 = vector.broadcast %6 : vector<1x4xf32> to vector<16x4xf32>
    %321 = arith.mulf %320, %257 : vector<16x4xf32>
    %322 = arith.addf %13, %321 : vector<16x4xf32>
    %323 = vector.broadcast %2 : vector<1x4xf32> to vector<16x4xf32>
    %324 = arith.mulf %323, %210 : vector<16x4xf32>
    %325 = arith.addf %322, %324 : vector<16x4xf32>
    %326 = vector.broadcast %3 : vector<1x4xf32> to vector<16x4xf32>
    %327 = arith.mulf %326, %205 : vector<16x4xf32>
    %328 = arith.addf %325, %327 : vector<16x4xf32>
    %329 = vector.broadcast %4 : vector<1x4xf32> to vector<16x4xf32>
    %330 = arith.mulf %329, %215 : vector<16x4xf32>
    %331 = arith.addf %328, %330 : vector<16x4xf32>
    %332 = vector.broadcast %5 : vector<1x4xf32> to vector<16x4xf32>
    %333 = arith.mulf %332, %262 : vector<16x4xf32>
    %334 = arith.addf %331, %333 : vector<16x4xf32>
    %335 = vector.broadcast %7 : vector<1x4xf32> to vector<16x4xf32>
    %336 = arith.mulf %335, %267 : vector<16x4xf32>
    %337 = arith.addf %334, %336 : vector<16x4xf32>
    %338 = vector.broadcast %8 : vector<1x4xf32> to vector<16x4xf32>
    %339 = arith.mulf %338, %314 : vector<16x4xf32>
    %340 = arith.addf %337, %339 : vector<16x4xf32>
    %341 = vector.broadcast %9 : vector<1x4xf32> to vector<16x4xf32>
    %342 = arith.mulf %341, %309 : vector<16x4xf32>
    %343 = arith.addf %340, %342 : vector<16x4xf32>
    %344 = vector.broadcast %10 : vector<1x4xf32> to vector<16x4xf32>
    %345 = arith.mulf %344, %319 : vector<16x4xf32>
    %346 = arith.addf %343, %345 : vector<16x4xf32>
    %347 = vector.shape_cast %346 : vector<16x4xf32> to vector<1x16x4xf32>
    %c0_100 = arith.constant 0 : index
    %348 = arith.index_cast %c5_i32 : i32 to index
    %c0_101 = arith.constant 0 : index
    %c0_102 = arith.constant 0 : index
    %349 = vector.load %arg7[%c0_100, %348, %c0_101, %c0_102] : memref<1x16x16x4xf32, #tpu.memory_space<vmem>>, vector<1x1x16x4xf32>
    %350 = vector.shape_cast %349 : vector<1x1x16x4xf32> to vector<1x16x4xf32>
    %351 = vector.shape_cast %347 : vector<1x16x4xf32> to vector<1x1x16x4xf32>
    tpu.vector_store %arg7[%c0_100, %348, %c0_101, %c0_102], %351 {strides = array<i32>} : memref<1x16x16x4xf32, #tpu.memory_space<vmem>>, vector<1x1x16x4xf32>,
    %c6_i32 = arith.constant 6 : i32
    %c1_i32_103 = arith.constant 1 : i32
    %352 = arith.addi %c6_i32, %c1_i32_103 : i32
    %c0_104 = arith.constant 0 : index
    %353 = arith.index_cast %352 : i32 to index
    %c0_105 = arith.constant 0 : index
    %c0_106 = arith.constant 0 : index
    %354 = vector.load %arg2[%c0_104, %353, %c0_105, %c0_106] : memref<1x16x16x4xf32, #tpu.memory_space<vmem>>, vector<1x1x16x4xf32>
    %355 = vector.shape_cast %354 : vector<1x1x16x4xf32> to vector<1x16x4xf32>
    %356 = vector.shape_cast %355 : vector<1x16x4xf32> to vector<16x4xf32>
    %357 = arith.addi %0, %c6_i32 : i32
    %c1_i32_107 = arith.constant 1 : i32
    %358 = arith.addi %357, %c1_i32_107 : i32
    %c16_i32_108 = arith.constant 16 : i32
    %359 = arith.cmpi slt, %358, %c16_i32_108 : i32
    %cst_109 = arith.constant 0.000000e+00 : f32
    %360 = vector.broadcast %cst_109 : f32 to vector<16x4xf32>
    %361 = arith.select %359, %356, %360 : vector<16x4xf32>
    %c1_i32_110 = arith.constant 1 : i32
    %362 = tpu.dynamic_rotate %361 by %c1_i32_110 dim 0 : vector<16x4xf32>, i32 -> vector<16x4xf32>
    %cst_111 = arith.constant 0.000000e+00 : f32
    %363 = vector.shape_cast %16 : vector<16x1xi1> to vector<16x1xi1>
    %364 = vector.broadcast %363 : vector<16x1xi1> to vector<16x4xi1>
    %365 = vector.broadcast %cst_111 : f32 to vector<16x4xf32>
    %366 = arith.select %364, %362, %365 : vector<16x4xi1>, vector<16x4xf32>
    %c15_i32_112 = arith.constant 15 : i32
    %367 = tpu.dynamic_rotate %361 by %c15_i32_112 dim 0 : vector<16x4xf32>, i32 -> vector<16x4xf32>
    %cst_113 = arith.constant 0.000000e+00 : f32
    %368 = vector.shape_cast %18 : vector<16x1xi1> to vector<16x1xi1>
    %369 = vector.broadcast %368 : vector<16x1xi1> to vector<16x4xi1>
    %370 = vector.broadcast %cst_113 : f32 to vector<16x4xf32>
    %371 = arith.select %369, %367, %370 : vector<16x4xi1>, vector<16x4xf32>
    %372 = vector.broadcast %6 : vector<1x4xf32> to vector<16x4xf32>
    %373 = arith.mulf %372, %309 : vector<16x4xf32>
    %374 = arith.addf %13, %373 : vector<16x4xf32>
    %375 = vector.broadcast %2 : vector<1x4xf32> to vector<16x4xf32>
    %376 = arith.mulf %375, %262 : vector<16x4xf32>
    %377 = arith.addf %374, %376 : vector<16x4xf32>
    %378 = vector.broadcast %3 : vector<1x4xf32> to vector<16x4xf32>
    %379 = arith.mulf %378, %257 : vector<16x4xf32>
    %380 = arith.addf %377, %379 : vector<16x4xf32>
    %381 = vector.broadcast %4 : vector<1x4xf32> to vector<16x4xf32>
    %382 = arith.mulf %381, %267 : vector<16x4xf32>
    %383 = arith.addf %380, %382 : vector<16x4xf32>
    %384 = vector.broadcast %5 : vector<1x4xf32> to vector<16x4xf32>
    %385 = arith.mulf %384, %314 : vector<16x4xf32>
    %386 = arith.addf %383, %385 : vector<16x4xf32>
    %387 = vector.broadcast %7 : vector<1x4xf32> to vector<16x4xf32>
    %388 = arith.mulf %387, %319 : vector<16x4xf32>
    %389 = arith.addf %386, %388 : vector<16x4xf32>
    %390 = vector.broadcast %8 : vector<1x4xf32> to vector<16x4xf32>
    %391 = arith.mulf %390, %366 : vector<16x4xf32>
    %392 = arith.addf %389, %391 : vector<16x4xf32>
    %393 = vector.broadcast %9 : vector<1x4xf32> to vector<16x4xf32>
    %394 = arith.mulf %393, %361 : vector<16x4xf32>
    %395 = arith.addf %392, %394 : vector<16x4xf32>
    %396 = vector.broadcast %10 : vector<1x4xf32> to vector<16x4xf32>
    %397 = arith.mulf %396, %371 : vector<16x4xf32>
    %398 = arith.addf %395, %397 : vector<16x4xf32>
    %399 = vector.shape_cast %398 : vector<16x4xf32> to vector<1x16x4xf32>
    %c0_114 = arith.constant 0 : index
    %400 = arith.index_cast %c6_i32 : i32 to index
    %c0_115 = arith.constant 0 : index
    %c0_116 = arith.constant 0 : index
    %401 = vector.load %arg7[%c0_114, %400, %c0_115, %c0_116] : memref<1x16x16x4xf32, #tpu.memory_space<vmem>>, vector<1x1x16x4xf32>
    %402 = vector.shape_cast %401 : vector<1x1x16x4xf32> to vector<1x16x4xf32>
    %403 = vector.shape_cast %399 : vector<1x16x4xf32> to vector<1x1x16x4xf32>
    tpu.vector_store %arg7[%c0_114, %400, %c0_115, %c0_116], %403 {strides = array<i32>} : memref<1x16x16x4xf32, #tpu.memory_space<vmem>>, vector<1x1x16x4xf32>,
    %c7_i32 = arith.constant 7 : i32
    %c1_i32_117 = arith.constant 1 : i32
    %404 = arith.addi %c7_i32, %c1_i32_117 : i32
    %c0_118 = arith.constant 0 : index
    %405 = arith.index_cast %404 : i32 to index
    %c0_119 = arith.constant 0 : index
    %c0_120 = arith.constant 0 : index
    %406 = vector.load %arg2[%c0_118, %405, %c0_119, %c0_120] : memref<1x16x16x4xf32, #tpu.memory_space<vmem>>, vector<1x1x16x4xf32>
    %407 = vector.shape_cast %406 : vector<1x1x16x4xf32> to vector<1x16x4xf32>
    %408 = vector.shape_cast %407 : vector<1x16x4xf32> to vector<16x4xf32>
    %409 = arith.addi %0, %c7_i32 : i32
    %c1_i32_121 = arith.constant 1 : i32
    %410 = arith.addi %409, %c1_i32_121 : i32
    %c16_i32_122 = arith.constant 16 : i32
    %411 = arith.cmpi slt, %410, %c16_i32_122 : i32
    %cst_123 = arith.constant 0.000000e+00 : f32
    %412 = vector.broadcast %cst_123 : f32 to vector<16x4xf32>
    %413 = arith.select %411, %408, %412 : vector<16x4xf32>
    %c1_i32_124 = arith.constant 1 : i32
    %414 = tpu.dynamic_rotate %413 by %c1_i32_124 dim 0 : vector<16x4xf32>, i32 -> vector<16x4xf32>
    %cst_125 = arith.constant 0.000000e+00 : f32
    %415 = vector.shape_cast %16 : vector<16x1xi1> to vector<16x1xi1>
    %416 = vector.broadcast %415 : vector<16x1xi1> to vector<16x4xi1>
    %417 = vector.broadcast %cst_125 : f32 to vector<16x4xf32>
    %418 = arith.select %416, %414, %417 : vector<16x4xi1>, vector<16x4xf32>
    %c15_i32_126 = arith.constant 15 : i32
    %419 = tpu.dynamic_rotate %413 by %c15_i32_126 dim 0 : vector<16x4xf32>, i32 -> vector<16x4xf32>
    %cst_127 = arith.constant 0.000000e+00 : f32
    %420 = vector.shape_cast %18 : vector<16x1xi1> to vector<16x1xi1>
    %421 = vector.broadcast %420 : vector<16x1xi1> to vector<16x4xi1>
    %422 = vector.broadcast %cst_127 : f32 to vector<16x4xf32>
    %423 = arith.select %421, %419, %422 : vector<16x4xi1>, vector<16x4xf32>
    %424 = vector.broadcast %6 : vector<1x4xf32> to vector<16x4xf32>
    %425 = arith.mulf %424, %361 : vector<16x4xf32>
    %426 = arith.addf %13, %425 : vector<16x4xf32>
    %427 = vector.broadcast %2 : vector<1x4xf32> to vector<16x4xf32>
    %428 = arith.mulf %427, %314 : vector<16x4xf32>
    %429 = arith.addf %426, %428 : vector<16x4xf32>
    %430 = vector.broadcast %3 : vector<1x4xf32> to vector<16x4xf32>
    %431 = arith.mulf %430, %309 : vector<16x4xf32>
    %432 = arith.addf %429, %431 : vector<16x4xf32>
    %433 = vector.broadcast %4 : vector<1x4xf32> to vector<16x4xf32>
    %434 = arith.mulf %433, %319 : vector<16x4xf32>
    %435 = arith.addf %432, %434 : vector<16x4xf32>
    %436 = vector.broadcast %5 : vector<1x4xf32> to vector<16x4xf32>
    %437 = arith.mulf %436, %366 : vector<16x4xf32>
    %438 = arith.addf %435, %437 : vector<16x4xf32>
    %439 = vector.broadcast %7 : vector<1x4xf32> to vector<16x4xf32>
    %440 = arith.mulf %439, %371 : vector<16x4xf32>
    %441 = arith.addf %438, %440 : vector<16x4xf32>
    %442 = vector.broadcast %8 : vector<1x4xf32> to vector<16x4xf32>
    %443 = arith.mulf %442, %418 : vector<16x4xf32>
    %444 = arith.addf %441, %443 : vector<16x4xf32>
    %445 = vector.broadcast %9 : vector<1x4xf32> to vector<16x4xf32>
    %446 = arith.mulf %445, %413 : vector<16x4xf32>
    %447 = arith.addf %444, %446 : vector<16x4xf32>
    %448 = vector.broadcast %10 : vector<1x4xf32> to vector<16x4xf32>
    %449 = arith.mulf %448, %423 : vector<16x4xf32>
    %450 = arith.addf %447, %449 : vector<16x4xf32>
    %451 = vector.shape_cast %450 : vector<16x4xf32> to vector<1x16x4xf32>
    %c0_128 = arith.constant 0 : index
    %452 = arith.index_cast %c7_i32 : i32 to index
    %c0_129 = arith.constant 0 : index
    %c0_130 = arith.constant 0 : index
    %453 = vector.load %arg7[%c0_128, %452, %c0_129, %c0_130] : memref<1x16x16x4xf32, #tpu.memory_space<vmem>>, vector<1x1x16x4xf32>
    %454 = vector.shape_cast %453 : vector<1x1x16x4xf32> to vector<1x16x4xf32>
    %455 = vector.shape_cast %451 : vector<1x16x4xf32> to vector<1x1x16x4xf32>
    tpu.vector_store %arg7[%c0_128, %452, %c0_129, %c0_130], %455 {strides = array<i32>} : memref<1x16x16x4xf32, #tpu.memory_space<vmem>>, vector<1x1x16x4xf32>,
    %c8_i32 = arith.constant 8 : i32
    %c1_i32_131 = arith.constant 1 : i32
    %456 = arith.addi %c8_i32, %c1_i32_131 : i32
    %c0_132 = arith.constant 0 : index
    %457 = arith.index_cast %456 : i32 to index
    %c0_133 = arith.constant 0 : index
    %c0_134 = arith.constant 0 : index
    %458 = vector.load %arg2[%c0_132, %457, %c0_133, %c0_134] : memref<1x16x16x4xf32, #tpu.memory_space<vmem>>, vector<1x1x16x4xf32>
    %459 = vector.shape_cast %458 : vector<1x1x16x4xf32> to vector<1x16x4xf32>
    %460 = vector.shape_cast %459 : vector<1x16x4xf32> to vector<16x4xf32>
    %461 = arith.addi %0, %c8_i32 : i32
    %c1_i32_135 = arith.constant 1 : i32
    %462 = arith.addi %461, %c1_i32_135 : i32
    %c16_i32_136 = arith.constant 16 : i32
    %463 = arith.cmpi slt, %462, %c16_i32_136 : i32
    %cst_137 = arith.constant 0.000000e+00 : f32
    %464 = vector.broadcast %cst_137 : f32 to vector<16x4xf32>
    %465 = arith.select %463, %460, %464 : vector<16x4xf32>
    %c1_i32_138 = arith.constant 1 : i32
    %466 = tpu.dynamic_rotate %465 by %c1_i32_138 dim 0 : vector<16x4xf32>, i32 -> vector<16x4xf32>
    %cst_139 = arith.constant 0.000000e+00 : f32
    %467 = vector.shape_cast %16 : vector<16x1xi1> to vector<16x1xi1>
    %468 = vector.broadcast %467 : vector<16x1xi1> to vector<16x4xi1>
    %469 = vector.broadcast %cst_139 : f32 to vector<16x4xf32>
    %470 = arith.select %468, %466, %469 : vector<16x4xi1>, vector<16x4xf32>
    %c15_i32_140 = arith.constant 15 : i32
    %471 = tpu.dynamic_rotate %465 by %c15_i32_140 dim 0 : vector<16x4xf32>, i32 -> vector<16x4xf32>
    %cst_141 = arith.constant 0.000000e+00 : f32
    %472 = vector.shape_cast %18 : vector<16x1xi1> to vector<16x1xi1>
    %473 = vector.broadcast %472 : vector<16x1xi1> to vector<16x4xi1>
    %474 = vector.broadcast %cst_141 : f32 to vector<16x4xf32>
    %475 = arith.select %473, %471, %474 : vector<16x4xi1>, vector<16x4xf32>
    %476 = vector.broadcast %6 : vector<1x4xf32> to vector<16x4xf32>
    %477 = arith.mulf %476, %413 : vector<16x4xf32>
    %478 = arith.addf %13, %477 : vector<16x4xf32>
    %479 = vector.broadcast %2 : vector<1x4xf32> to vector<16x4xf32>
    %480 = arith.mulf %479, %366 : vector<16x4xf32>
    %481 = arith.addf %478, %480 : vector<16x4xf32>
    %482 = vector.broadcast %3 : vector<1x4xf32> to vector<16x4xf32>
    %483 = arith.mulf %482, %361 : vector<16x4xf32>
    %484 = arith.addf %481, %483 : vector<16x4xf32>
    %485 = vector.broadcast %4 : vector<1x4xf32> to vector<16x4xf32>
    %486 = arith.mulf %485, %371 : vector<16x4xf32>
    %487 = arith.addf %484, %486 : vector<16x4xf32>
    %488 = vector.broadcast %5 : vector<1x4xf32> to vector<16x4xf32>
    %489 = arith.mulf %488, %418 : vector<16x4xf32>
    %490 = arith.addf %487, %489 : vector<16x4xf32>
    %491 = vector.broadcast %7 : vector<1x4xf32> to vector<16x4xf32>
    %492 = arith.mulf %491, %423 : vector<16x4xf32>
    %493 = arith.addf %490, %492 : vector<16x4xf32>
    %494 = vector.broadcast %8 : vector<1x4xf32> to vector<16x4xf32>
    %495 = arith.mulf %494, %470 : vector<16x4xf32>
    %496 = arith.addf %493, %495 : vector<16x4xf32>
    %497 = vector.broadcast %9 : vector<1x4xf32> to vector<16x4xf32>
    %498 = arith.mulf %497, %465 : vector<16x4xf32>
    %499 = arith.addf %496, %498 : vector<16x4xf32>
    %500 = vector.broadcast %10 : vector<1x4xf32> to vector<16x4xf32>
    %501 = arith.mulf %500, %475 : vector<16x4xf32>
    %502 = arith.addf %499, %501 : vector<16x4xf32>
    %503 = vector.shape_cast %502 : vector<16x4xf32> to vector<1x16x4xf32>
    %c0_142 = arith.constant 0 : index
    %504 = arith.index_cast %c8_i32 : i32 to index
    %c0_143 = arith.constant 0 : index
    %c0_144 = arith.constant 0 : index
    %505 = vector.load %arg7[%c0_142, %504, %c0_143, %c0_144] : memref<1x16x16x4xf32, #tpu.memory_space<vmem>>, vector<1x1x16x4xf32>
    %506 = vector.shape_cast %505 : vector<1x1x16x4xf32> to vector<1x16x4xf32>
    %507 = vector.shape_cast %503 : vector<1x16x4xf32> to vector<1x1x16x4xf32>
    tpu.vector_store %arg7[%c0_142, %504, %c0_143, %c0_144], %507 {strides = array<i32>} : memref<1x16x16x4xf32, #tpu.memory_space<vmem>>, vector<1x1x16x4xf32>,
    %c9_i32 = arith.constant 9 : i32
    %c1_i32_145 = arith.constant 1 : i32
    %508 = arith.addi %c9_i32, %c1_i32_145 : i32
    %c0_146 = arith.constant 0 : index
    %509 = arith.index_cast %508 : i32 to index
    %c0_147 = arith.constant 0 : index
    %c0_148 = arith.constant 0 : index
    %510 = vector.load %arg2[%c0_146, %509, %c0_147, %c0_148] : memref<1x16x16x4xf32, #tpu.memory_space<vmem>>, vector<1x1x16x4xf32>
    %511 = vector.shape_cast %510 : vector<1x1x16x4xf32> to vector<1x16x4xf32>
    %512 = vector.shape_cast %511 : vector<1x16x4xf32> to vector<16x4xf32>
    %513 = arith.addi %0, %c9_i32 : i32
    %c1_i32_149 = arith.constant 1 : i32
    %514 = arith.addi %513, %c1_i32_149 : i32
    %c16_i32_150 = arith.constant 16 : i32
    %515 = arith.cmpi slt, %514, %c16_i32_150 : i32
    %cst_151 = arith.constant 0.000000e+00 : f32
    %516 = vector.broadcast %cst_151 : f32 to vector<16x4xf32>
    %517 = arith.select %515, %512, %516 : vector<16x4xf32>
    %c1_i32_152 = arith.constant 1 : i32
    %518 = tpu.dynamic_rotate %517 by %c1_i32_152 dim 0 : vector<16x4xf32>, i32 -> vector<16x4xf32>
    %cst_153 = arith.constant 0.000000e+00 : f32
    %519 = vector.shape_cast %16 : vector<16x1xi1> to vector<16x1xi1>
    %520 = vector.broadcast %519 : vector<16x1xi1> to vector<16x4xi1>
    %521 = vector.broadcast %cst_153 : f32 to vector<16x4xf32>
    %522 = arith.select %520, %518, %521 : vector<16x4xi1>, vector<16x4xf32>
    %c15_i32_154 = arith.constant 15 : i32
    %523 = tpu.dynamic_rotate %517 by %c15_i32_154 dim 0 : vector<16x4xf32>, i32 -> vector<16x4xf32>
    %cst_155 = arith.constant 0.000000e+00 : f32
    %524 = vector.shape_cast %18 : vector<16x1xi1> to vector<16x1xi1>
    %525 = vector.broadcast %524 : vector<16x1xi1> to vector<16x4xi1>
    %526 = vector.broadcast %cst_155 : f32 to vector<16x4xf32>
    %527 = arith.select %525, %523, %526 : vector<16x4xi1>, vector<16x4xf32>
    %528 = vector.broadcast %6 : vector<1x4xf32> to vector<16x4xf32>
    %529 = arith.mulf %528, %465 : vector<16x4xf32>
    %530 = arith.addf %13, %529 : vector<16x4xf32>
    %531 = vector.broadcast %2 : vector<1x4xf32> to vector<16x4xf32>
    %532 = arith.mulf %531, %418 : vector<16x4xf32>
    %533 = arith.addf %530, %532 : vector<16x4xf32>
    %534 = vector.broadcast %3 : vector<1x4xf32> to vector<16x4xf32>
    %535 = arith.mulf %534, %413 : vector<16x4xf32>
    %536 = arith.addf %533, %535 : vector<16x4xf32>
    %537 = vector.broadcast %4 : vector<1x4xf32> to vector<16x4xf32>
    %538 = arith.mulf %537, %423 : vector<16x4xf32>
    %539 = arith.addf %536, %538 : vector<16x4xf32>
    %540 = vector.broadcast %5 : vector<1x4xf32> to vector<16x4xf32>
    %541 = arith.mulf %540, %470 : vector<16x4xf32>
    %542 = arith.addf %539, %541 : vector<16x4xf32>
    %543 = vector.broadcast %7 : vector<1x4xf32> to vector<16x4xf32>
    %544 = arith.mulf %543, %475 : vector<16x4xf32>
    %545 = arith.addf %542, %544 : vector<16x4xf32>
    %546 = vector.broadcast %8 : vector<1x4xf32> to vector<16x4xf32>
    %547 = arith.mulf %546, %522 : vector<16x4xf32>
    %548 = arith.addf %545, %547 : vector<16x4xf32>
    %549 = vector.broadcast %9 : vector<1x4xf32> to vector<16x4xf32>
    %550 = arith.mulf %549, %517 : vector<16x4xf32>
    %551 = arith.addf %548, %550 : vector<16x4xf32>
    %552 = vector.broadcast %10 : vector<1x4xf32> to vector<16x4xf32>
    %553 = arith.mulf %552, %527 : vector<16x4xf32>
    %554 = arith.addf %551, %553 : vector<16x4xf32>
    %555 = vector.shape_cast %554 : vector<16x4xf32> to vector<1x16x4xf32>
    %c0_156 = arith.constant 0 : index
    %556 = arith.index_cast %c9_i32 : i32 to index
    %c0_157 = arith.constant 0 : index
    %c0_158 = arith.constant 0 : index
    %557 = vector.load %arg7[%c0_156, %556, %c0_157, %c0_158] : memref<1x16x16x4xf32, #tpu.memory_space<vmem>>, vector<1x1x16x4xf32>
    %558 = vector.shape_cast %557 : vector<1x1x16x4xf32> to vector<1x16x4xf32>
    %559 = vector.shape_cast %555 : vector<1x16x4xf32> to vector<1x1x16x4xf32>
    tpu.vector_store %arg7[%c0_156, %556, %c0_157, %c0_158], %559 {strides = array<i32>} : memref<1x16x16x4xf32, #tpu.memory_space<vmem>>, vector<1x1x16x4xf32>,
    %c10_i32 = arith.constant 10 : i32
    %c1_i32_159 = arith.constant 1 : i32
    %560 = arith.addi %c10_i32, %c1_i32_159 : i32
    %c0_160 = arith.constant 0 : index
    %561 = arith.index_cast %560 : i32 to index
    %c0_161 = arith.constant 0 : index
    %c0_162 = arith.constant 0 : index
    %562 = vector.load %arg2[%c0_160, %561, %c0_161, %c0_162] : memref<1x16x16x4xf32, #tpu.memory_space<vmem>>, vector<1x1x16x4xf32>
    %563 = vector.shape_cast %562 : vector<1x1x16x4xf32> to vector<1x16x4xf32>
    %564 = vector.shape_cast %563 : vector<1x16x4xf32> to vector<16x4xf32>
    %565 = arith.addi %0, %c10_i32 : i32
    %c1_i32_163 = arith.constant 1 : i32
    %566 = arith.addi %565, %c1_i32_163 : i32
    %c16_i32_164 = arith.constant 16 : i32
    %567 = arith.cmpi slt, %566, %c16_i32_164 : i32
    %cst_165 = arith.constant 0.000000e+00 : f32
    %568 = vector.broadcast %cst_165 : f32 to vector<16x4xf32>
    %569 = arith.select %567, %564, %568 : vector<16x4xf32>
    %c1_i32_166 = arith.constant 1 : i32
    %570 = tpu.dynamic_rotate %569 by %c1_i32_166 dim 0 : vector<16x4xf32>, i32 -> vector<16x4xf32>
    %cst_167 = arith.constant 0.000000e+00 : f32
    %571 = vector.shape_cast %16 : vector<16x1xi1> to vector<16x1xi1>
    %572 = vector.broadcast %571 : vector<16x1xi1> to vector<16x4xi1>
    %573 = vector.broadcast %cst_167 : f32 to vector<16x4xf32>
    %574 = arith.select %572, %570, %573 : vector<16x4xi1>, vector<16x4xf32>
    %c15_i32_168 = arith.constant 15 : i32
    %575 = tpu.dynamic_rotate %569 by %c15_i32_168 dim 0 : vector<16x4xf32>, i32 -> vector<16x4xf32>
    %cst_169 = arith.constant 0.000000e+00 : f32
    %576 = vector.shape_cast %18 : vector<16x1xi1> to vector<16x1xi1>
    %577 = vector.broadcast %576 : vector<16x1xi1> to vector<16x4xi1>
    %578 = vector.broadcast %cst_169 : f32 to vector<16x4xf32>
    %579 = arith.select %577, %575, %578 : vector<16x4xi1>, vector<16x4xf32>
    %580 = vector.broadcast %6 : vector<1x4xf32> to vector<16x4xf32>
    %581 = arith.mulf %580, %517 : vector<16x4xf32>
    %582 = arith.addf %13, %581 : vector<16x4xf32>
    %583 = vector.broadcast %2 : vector<1x4xf32> to vector<16x4xf32>
    %584 = arith.mulf %583, %470 : vector<16x4xf32>
    %585 = arith.addf %582, %584 : vector<16x4xf32>
    %586 = vector.broadcast %3 : vector<1x4xf32> to vector<16x4xf32>
    %587 = arith.mulf %586, %465 : vector<16x4xf32>
    %588 = arith.addf %585, %587 : vector<16x4xf32>
    %589 = vector.broadcast %4 : vector<1x4xf32> to vector<16x4xf32>
    %590 = arith.mulf %589, %475 : vector<16x4xf32>
    %591 = arith.addf %588, %590 : vector<16x4xf32>
    %592 = vector.broadcast %5 : vector<1x4xf32> to vector<16x4xf32>
    %593 = arith.mulf %592, %522 : vector<16x4xf32>
    %594 = arith.addf %591, %593 : vector<16x4xf32>
    %595 = vector.broadcast %7 : vector<1x4xf32> to vector<16x4xf32>
    %596 = arith.mulf %595, %527 : vector<16x4xf32>
    %597 = arith.addf %594, %596 : vector<16x4xf32>
    %598 = vector.broadcast %8 : vector<1x4xf32> to vector<16x4xf32>
    %599 = arith.mulf %598, %574 : vector<16x4xf32>
    %600 = arith.addf %597, %599 : vector<16x4xf32>
    %601 = vector.broadcast %9 : vector<1x4xf32> to vector<16x4xf32>
    %602 = arith.mulf %601, %569 : vector<16x4xf32>
    %603 = arith.addf %600, %602 : vector<16x4xf32>
    %604 = vector.broadcast %10 : vector<1x4xf32> to vector<16x4xf32>
    %605 = arith.mulf %604, %579 : vector<16x4xf32>
    %606 = arith.addf %603, %605 : vector<16x4xf32>
    %607 = vector.shape_cast %606 : vector<16x4xf32> to vector<1x16x4xf32>
    %c0_170 = arith.constant 0 : index
    %608 = arith.index_cast %c10_i32 : i32 to index
    %c0_171 = arith.constant 0 : index
    %c0_172 = arith.constant 0 : index
    %609 = vector.load %arg7[%c0_170, %608, %c0_171, %c0_172] : memref<1x16x16x4xf32, #tpu.memory_space<vmem>>, vector<1x1x16x4xf32>
    %610 = vector.shape_cast %609 : vector<1x1x16x4xf32> to vector<1x16x4xf32>
    %611 = vector.shape_cast %607 : vector<1x16x4xf32> to vector<1x1x16x4xf32>
    tpu.vector_store %arg7[%c0_170, %608, %c0_171, %c0_172], %611 {strides = array<i32>} : memref<1x16x16x4xf32, #tpu.memory_space<vmem>>, vector<1x1x16x4xf32>,
    %c11_i32 = arith.constant 11 : i32
    %c1_i32_173 = arith.constant 1 : i32
    %612 = arith.addi %c11_i32, %c1_i32_173 : i32
    %c0_174 = arith.constant 0 : index
    %613 = arith.index_cast %612 : i32 to index
    %c0_175 = arith.constant 0 : index
    %c0_176 = arith.constant 0 : index
    %614 = vector.load %arg2[%c0_174, %613, %c0_175, %c0_176] : memref<1x16x16x4xf32, #tpu.memory_space<vmem>>, vector<1x1x16x4xf32>
    %615 = vector.shape_cast %614 : vector<1x1x16x4xf32> to vector<1x16x4xf32>
    %616 = vector.shape_cast %615 : vector<1x16x4xf32> to vector<16x4xf32>
    %617 = arith.addi %0, %c11_i32 : i32
    %c1_i32_177 = arith.constant 1 : i32
    %618 = arith.addi %617, %c1_i32_177 : i32
    %c16_i32_178 = arith.constant 16 : i32
    %619 = arith.cmpi slt, %618, %c16_i32_178 : i32
    %cst_179 = arith.constant 0.000000e+00 : f32
    %620 = vector.broadcast %cst_179 : f32 to vector<16x4xf32>
    %621 = arith.select %619, %616, %620 : vector<16x4xf32>
    %c1_i32_180 = arith.constant 1 : i32
    %622 = tpu.dynamic_rotate %621 by %c1_i32_180 dim 0 : vector<16x4xf32>, i32 -> vector<16x4xf32>
    %cst_181 = arith.constant 0.000000e+00 : f32
    %623 = vector.shape_cast %16 : vector<16x1xi1> to vector<16x1xi1>
    %624 = vector.broadcast %623 : vector<16x1xi1> to vector<16x4xi1>
    %625 = vector.broadcast %cst_181 : f32 to vector<16x4xf32>
    %626 = arith.select %624, %622, %625 : vector<16x4xi1>, vector<16x4xf32>
    %c15_i32_182 = arith.constant 15 : i32
    %627 = tpu.dynamic_rotate %621 by %c15_i32_182 dim 0 : vector<16x4xf32>, i32 -> vector<16x4xf32>
    %cst_183 = arith.constant 0.000000e+00 : f32
    %628 = vector.shape_cast %18 : vector<16x1xi1> to vector<16x1xi1>
    %629 = vector.broadcast %628 : vector<16x1xi1> to vector<16x4xi1>
    %630 = vector.broadcast %cst_183 : f32 to vector<16x4xf32>
    %631 = arith.select %629, %627, %630 : vector<16x4xi1>, vector<16x4xf32>
    %632 = vector.broadcast %6 : vector<1x4xf32> to vector<16x4xf32>
    %633 = arith.mulf %632, %569 : vector<16x4xf32>
    %634 = arith.addf %13, %633 : vector<16x4xf32>
    %635 = vector.broadcast %2 : vector<1x4xf32> to vector<16x4xf32>
    %636 = arith.mulf %635, %522 : vector<16x4xf32>
    %637 = arith.addf %634, %636 : vector<16x4xf32>
    %638 = vector.broadcast %3 : vector<1x4xf32> to vector<16x4xf32>
    %639 = arith.mulf %638, %517 : vector<16x4xf32>
    %640 = arith.addf %637, %639 : vector<16x4xf32>
    %641 = vector.broadcast %4 : vector<1x4xf32> to vector<16x4xf32>
    %642 = arith.mulf %641, %527 : vector<16x4xf32>
    %643 = arith.addf %640, %642 : vector<16x4xf32>
    %644 = vector.broadcast %5 : vector<1x4xf32> to vector<16x4xf32>
    %645 = arith.mulf %644, %574 : vector<16x4xf32>
    %646 = arith.addf %643, %645 : vector<16x4xf32>
    %647 = vector.broadcast %7 : vector<1x4xf32> to vector<16x4xf32>
    %648 = arith.mulf %647, %579 : vector<16x4xf32>
    %649 = arith.addf %646, %648 : vector<16x4xf32>
    %650 = vector.broadcast %8 : vector<1x4xf32> to vector<16x4xf32>
    %651 = arith.mulf %650, %626 : vector<16x4xf32>
    %652 = arith.addf %649, %651 : vector<16x4xf32>
    %653 = vector.broadcast %9 : vector<1x4xf32> to vector<16x4xf32>
    %654 = arith.mulf %653, %621 : vector<16x4xf32>
    %655 = arith.addf %652, %654 : vector<16x4xf32>
    %656 = vector.broadcast %10 : vector<1x4xf32> to vector<16x4xf32>
    %657 = arith.mulf %656, %631 : vector<16x4xf32>
    %658 = arith.addf %655, %657 : vector<16x4xf32>
    %659 = vector.shape_cast %658 : vector<16x4xf32> to vector<1x16x4xf32>
    %c0_184 = arith.constant 0 : index
    %660 = arith.index_cast %c11_i32 : i32 to index
    %c0_185 = arith.constant 0 : index
    %c0_186 = arith.constant 0 : index
    %661 = vector.load %arg7[%c0_184, %660, %c0_185, %c0_186] : memref<1x16x16x4xf32, #tpu.memory_space<vmem>>, vector<1x1x16x4xf32>
    %662 = vector.shape_cast %661 : vector<1x1x16x4xf32> to vector<1x16x4xf32>
    %663 = vector.shape_cast %659 : vector<1x16x4xf32> to vector<1x1x16x4xf32>
    tpu.vector_store %arg7[%c0_184, %660, %c0_185, %c0_186], %663 {strides = array<i32>} : memref<1x16x16x4xf32, #tpu.memory_space<vmem>>, vector<1x1x16x4xf32>,
    %c12_i32 = arith.constant 12 : i32
    %c1_i32_187 = arith.constant 1 : i32
    %664 = arith.addi %c12_i32, %c1_i32_187 : i32
    %c0_188 = arith.constant 0 : index
    %665 = arith.index_cast %664 : i32 to index
    %c0_189 = arith.constant 0 : index
    %c0_190 = arith.constant 0 : index
    %666 = vector.load %arg2[%c0_188, %665, %c0_189, %c0_190] : memref<1x16x16x4xf32, #tpu.memory_space<vmem>>, vector<1x1x16x4xf32>
    %667 = vector.shape_cast %666 : vector<1x1x16x4xf32> to vector<1x16x4xf32>
    %668 = vector.shape_cast %667 : vector<1x16x4xf32> to vector<16x4xf32>
    %669 = arith.addi %0, %c12_i32 : i32
    %c1_i32_191 = arith.constant 1 : i32
    %670 = arith.addi %669, %c1_i32_191 : i32
    %c16_i32_192 = arith.constant 16 : i32
    %671 = arith.cmpi slt, %670, %c16_i32_192 : i32
    %cst_193 = arith.constant 0.000000e+00 : f32
    %672 = vector.broadcast %cst_193 : f32 to vector<16x4xf32>
    %673 = arith.select %671, %668, %672 : vector<16x4xf32>
    %c1_i32_194 = arith.constant 1 : i32
    %674 = tpu.dynamic_rotate %673 by %c1_i32_194 dim 0 : vector<16x4xf32>, i32 -> vector<16x4xf32>
    %cst_195 = arith.constant 0.000000e+00 : f32
    %675 = vector.shape_cast %16 : vector<16x1xi1> to vector<16x1xi1>
    %676 = vector.broadcast %675 : vector<16x1xi1> to vector<16x4xi1>
    %677 = vector.broadcast %cst_195 : f32 to vector<16x4xf32>
    %678 = arith.select %676, %674, %677 : vector<16x4xi1>, vector<16x4xf32>
    %c15_i32_196 = arith.constant 15 : i32
    %679 = tpu.dynamic_rotate %673 by %c15_i32_196 dim 0 : vector<16x4xf32>, i32 -> vector<16x4xf32>
    %cst_197 = arith.constant 0.000000e+00 : f32
    %680 = vector.shape_cast %18 : vector<16x1xi1> to vector<16x1xi1>
    %681 = vector.broadcast %680 : vector<16x1xi1> to vector<16x4xi1>
    %682 = vector.broadcast %cst_197 : f32 to vector<16x4xf32>
    %683 = arith.select %681, %679, %682 : vector<16x4xi1>, vector<16x4xf32>
    %684 = vector.broadcast %6 : vector<1x4xf32> to vector<16x4xf32>
    %685 = arith.mulf %684, %621 : vector<16x4xf32>
    %686 = arith.addf %13, %685 : vector<16x4xf32>
    %687 = vector.broadcast %2 : vector<1x4xf32> to vector<16x4xf32>
    %688 = arith.mulf %687, %574 : vector<16x4xf32>
    %689 = arith.addf %686, %688 : vector<16x4xf32>
    %690 = vector.broadcast %3 : vector<1x4xf32> to vector<16x4xf32>
    %691 = arith.mulf %690, %569 : vector<16x4xf32>
    %692 = arith.addf %689, %691 : vector<16x4xf32>
    %693 = vector.broadcast %4 : vector<1x4xf32> to vector<16x4xf32>
    %694 = arith.mulf %693, %579 : vector<16x4xf32>
    %695 = arith.addf %692, %694 : vector<16x4xf32>
    %696 = vector.broadcast %5 : vector<1x4xf32> to vector<16x4xf32>
    %697 = arith.mulf %696, %626 : vector<16x4xf32>
    %698 = arith.addf %695, %697 : vector<16x4xf32>
    %699 = vector.broadcast %7 : vector<1x4xf32> to vector<16x4xf32>
    %700 = arith.mulf %699, %631 : vector<16x4xf32>
    %701 = arith.addf %698, %700 : vector<16x4xf32>
    %702 = vector.broadcast %8 : vector<1x4xf32> to vector<16x4xf32>
    %703 = arith.mulf %702, %678 : vector<16x4xf32>
    %704 = arith.addf %701, %703 : vector<16x4xf32>
    %705 = vector.broadcast %9 : vector<1x4xf32> to vector<16x4xf32>
    %706 = arith.mulf %705, %673 : vector<16x4xf32>
    %707 = arith.addf %704, %706 : vector<16x4xf32>
    %708 = vector.broadcast %10 : vector<1x4xf32> to vector<16x4xf32>
    %709 = arith.mulf %708, %683 : vector<16x4xf32>
    %710 = arith.addf %707, %709 : vector<16x4xf32>
    %711 = vector.shape_cast %710 : vector<16x4xf32> to vector<1x16x4xf32>
    %c0_198 = arith.constant 0 : index
    %712 = arith.index_cast %c12_i32 : i32 to index
    %c0_199 = arith.constant 0 : index
    %c0_200 = arith.constant 0 : index
    %713 = vector.load %arg7[%c0_198, %712, %c0_199, %c0_200] : memref<1x16x16x4xf32, #tpu.memory_space<vmem>>, vector<1x1x16x4xf32>
    %714 = vector.shape_cast %713 : vector<1x1x16x4xf32> to vector<1x16x4xf32>
    %715 = vector.shape_cast %711 : vector<1x16x4xf32> to vector<1x1x16x4xf32>
    tpu.vector_store %arg7[%c0_198, %712, %c0_199, %c0_200], %715 {strides = array<i32>} : memref<1x16x16x4xf32, #tpu.memory_space<vmem>>, vector<1x1x16x4xf32>,
    %c13_i32 = arith.constant 13 : i32
    %c1_i32_201 = arith.constant 1 : i32
    %716 = arith.addi %c13_i32, %c1_i32_201 : i32
    %c0_202 = arith.constant 0 : index
    %717 = arith.index_cast %716 : i32 to index
    %c0_203 = arith.constant 0 : index
    %c0_204 = arith.constant 0 : index
    %718 = vector.load %arg2[%c0_202, %717, %c0_203, %c0_204] : memref<1x16x16x4xf32, #tpu.memory_space<vmem>>, vector<1x1x16x4xf32>
    %719 = vector.shape_cast %718 : vector<1x1x16x4xf32> to vector<1x16x4xf32>
    %720 = vector.shape_cast %719 : vector<1x16x4xf32> to vector<16x4xf32>
    %721 = arith.addi %0, %c13_i32 : i32
    %c1_i32_205 = arith.constant 1 : i32
    %722 = arith.addi %721, %c1_i32_205 : i32
    %c16_i32_206 = arith.constant 16 : i32
    %723 = arith.cmpi slt, %722, %c16_i32_206 : i32
    %cst_207 = arith.constant 0.000000e+00 : f32
    %724 = vector.broadcast %cst_207 : f32 to vector<16x4xf32>
    %725 = arith.select %723, %720, %724 : vector<16x4xf32>
    %c1_i32_208 = arith.constant 1 : i32
    %726 = tpu.dynamic_rotate %725 by %c1_i32_208 dim 0 : vector<16x4xf32>, i32 -> vector<16x4xf32>
    %cst_209 = arith.constant 0.000000e+00 : f32
    %727 = vector.shape_cast %16 : vector<16x1xi1> to vector<16x1xi1>
    %728 = vector.broadcast %727 : vector<16x1xi1> to vector<16x4xi1>
    %729 = vector.broadcast %cst_209 : f32 to vector<16x4xf32>
    %730 = arith.select %728, %726, %729 : vector<16x4xi1>, vector<16x4xf32>
    %c15_i32_210 = arith.constant 15 : i32
    %731 = tpu.dynamic_rotate %725 by %c15_i32_210 dim 0 : vector<16x4xf32>, i32 -> vector<16x4xf32>
    %cst_211 = arith.constant 0.000000e+00 : f32
    %732 = vector.shape_cast %18 : vector<16x1xi1> to vector<16x1xi1>
    %733 = vector.broadcast %732 : vector<16x1xi1> to vector<16x4xi1>
    %734 = vector.broadcast %cst_211 : f32 to vector<16x4xf32>
    %735 = arith.select %733, %731, %734 : vector<16x4xi1>, vector<16x4xf32>
    %736 = vector.broadcast %6 : vector<1x4xf32> to vector<16x4xf32>
    %737 = arith.mulf %736, %673 : vector<16x4xf32>
    %738 = arith.addf %13, %737 : vector<16x4xf32>
    %739 = vector.broadcast %2 : vector<1x4xf32> to vector<16x4xf32>
    %740 = arith.mulf %739, %626 : vector<16x4xf32>
    %741 = arith.addf %738, %740 : vector<16x4xf32>
    %742 = vector.broadcast %3 : vector<1x4xf32> to vector<16x4xf32>
    %743 = arith.mulf %742, %621 : vector<16x4xf32>
    %744 = arith.addf %741, %743 : vector<16x4xf32>
    %745 = vector.broadcast %4 : vector<1x4xf32> to vector<16x4xf32>
    %746 = arith.mulf %745, %631 : vector<16x4xf32>
    %747 = arith.addf %744, %746 : vector<16x4xf32>
    %748 = vector.broadcast %5 : vector<1x4xf32> to vector<16x4xf32>
    %749 = arith.mulf %748, %678 : vector<16x4xf32>
    %750 = arith.addf %747, %749 : vector<16x4xf32>
    %751 = vector.broadcast %7 : vector<1x4xf32> to vector<16x4xf32>
    %752 = arith.mulf %751, %683 : vector<16x4xf32>
    %753 = arith.addf %750, %752 : vector<16x4xf32>
    %754 = vector.broadcast %8 : vector<1x4xf32> to vector<16x4xf32>
    %755 = arith.mulf %754, %730 : vector<16x4xf32>
    %756 = arith.addf %753, %755 : vector<16x4xf32>
    %757 = vector.broadcast %9 : vector<1x4xf32> to vector<16x4xf32>
    %758 = arith.mulf %757, %725 : vector<16x4xf32>
    %759 = arith.addf %756, %758 : vector<16x4xf32>
    %760 = vector.broadcast %10 : vector<1x4xf32> to vector<16x4xf32>
    %761 = arith.mulf %760, %735 : vector<16x4xf32>
    %762 = arith.addf %759, %761 : vector<16x4xf32>
    %763 = vector.shape_cast %762 : vector<16x4xf32> to vector<1x16x4xf32>
    %c0_212 = arith.constant 0 : index
    %764 = arith.index_cast %c13_i32 : i32 to index
    %c0_213 = arith.constant 0 : index
    %c0_214 = arith.constant 0 : index
    %765 = vector.load %arg7[%c0_212, %764, %c0_213, %c0_214] : memref<1x16x16x4xf32, #tpu.memory_space<vmem>>, vector<1x1x16x4xf32>
    %766 = vector.shape_cast %765 : vector<1x1x16x4xf32> to vector<1x16x4xf32>
    %767 = vector.shape_cast %763 : vector<1x16x4xf32> to vector<1x1x16x4xf32>
    tpu.vector_store %arg7[%c0_212, %764, %c0_213, %c0_214], %767 {strides = array<i32>} : memref<1x16x16x4xf32, #tpu.memory_space<vmem>>, vector<1x1x16x4xf32>,
    %c14_i32_215 = arith.constant 14 : i32
    %c1_i32_216 = arith.constant 1 : i32
    %768 = arith.addi %c14_i32_215, %c1_i32_216 : i32
    %c0_217 = arith.constant 0 : index
    %769 = arith.index_cast %768 : i32 to index
    %c0_218 = arith.constant 0 : index
    %c0_219 = arith.constant 0 : index
    %770 = vector.load %arg2[%c0_217, %769, %c0_218, %c0_219] : memref<1x16x16x4xf32, #tpu.memory_space<vmem>>, vector<1x1x16x4xf32>
    %771 = vector.shape_cast %770 : vector<1x1x16x4xf32> to vector<1x16x4xf32>
    %772 = vector.shape_cast %771 : vector<1x16x4xf32> to vector<16x4xf32>
    %773 = arith.addi %0, %c14_i32_215 : i32
    %c1_i32_220 = arith.constant 1 : i32
    %774 = arith.addi %773, %c1_i32_220 : i32
    %c16_i32_221 = arith.constant 16 : i32
    %775 = arith.cmpi slt, %774, %c16_i32_221 : i32
    %cst_222 = arith.constant 0.000000e+00 : f32
    %776 = vector.broadcast %cst_222 : f32 to vector<16x4xf32>
    %777 = arith.select %775, %772, %776 : vector<16x4xf32>
    %c1_i32_223 = arith.constant 1 : i32
    %778 = tpu.dynamic_rotate %777 by %c1_i32_223 dim 0 : vector<16x4xf32>, i32 -> vector<16x4xf32>
    %cst_224 = arith.constant 0.000000e+00 : f32
    %779 = vector.shape_cast %16 : vector<16x1xi1> to vector<16x1xi1>
    %780 = vector.broadcast %779 : vector<16x1xi1> to vector<16x4xi1>
    %781 = vector.broadcast %cst_224 : f32 to vector<16x4xf32>
    %782 = arith.select %780, %778, %781 : vector<16x4xi1>, vector<16x4xf32>
    %c15_i32_225 = arith.constant 15 : i32
    %783 = tpu.dynamic_rotate %777 by %c15_i32_225 dim 0 : vector<16x4xf32>, i32 -> vector<16x4xf32>
    %cst_226 = arith.constant 0.000000e+00 : f32
    %784 = vector.shape_cast %18 : vector<16x1xi1> to vector<16x1xi1>
    %785 = vector.broadcast %784 : vector<16x1xi1> to vector<16x4xi1>
    %786 = vector.broadcast %cst_226 : f32 to vector<16x4xf32>
    %787 = arith.select %785, %783, %786 : vector<16x4xi1>, vector<16x4xf32>
    %788 = vector.broadcast %6 : vector<1x4xf32> to vector<16x4xf32>
    %789 = arith.mulf %788, %725 : vector<16x4xf32>
    %790 = arith.addf %13, %789 : vector<16x4xf32>
    %791 = vector.broadcast %2 : vector<1x4xf32> to vector<16x4xf32>
    %792 = arith.mulf %791, %678 : vector<16x4xf32>
    %793 = arith.addf %790, %792 : vector<16x4xf32>
    %794 = vector.broadcast %3 : vector<1x4xf32> to vector<16x4xf32>
    %795 = arith.mulf %794, %673 : vector<16x4xf32>
    %796 = arith.addf %793, %795 : vector<16x4xf32>
    %797 = vector.broadcast %4 : vector<1x4xf32> to vector<16x4xf32>
    %798 = arith.mulf %797, %683 : vector<16x4xf32>
    %799 = arith.addf %796, %798 : vector<16x4xf32>
    %800 = vector.broadcast %5 : vector<1x4xf32> to vector<16x4xf32>
    %801 = arith.mulf %800, %730 : vector<16x4xf32>
    %802 = arith.addf %799, %801 : vector<16x4xf32>
    %803 = vector.broadcast %7 : vector<1x4xf32> to vector<16x4xf32>
    %804 = arith.mulf %803, %735 : vector<16x4xf32>
    %805 = arith.addf %802, %804 : vector<16x4xf32>
    %806 = vector.broadcast %8 : vector<1x4xf32> to vector<16x4xf32>
    %807 = arith.mulf %806, %782 : vector<16x4xf32>
    %808 = arith.addf %805, %807 : vector<16x4xf32>
    %809 = vector.broadcast %9 : vector<1x4xf32> to vector<16x4xf32>
    %810 = arith.mulf %809, %777 : vector<16x4xf32>
    %811 = arith.addf %808, %810 : vector<16x4xf32>
    %812 = vector.broadcast %10 : vector<1x4xf32> to vector<16x4xf32>
    %813 = arith.mulf %812, %787 : vector<16x4xf32>
    %814 = arith.addf %811, %813 : vector<16x4xf32>
    %815 = vector.shape_cast %814 : vector<16x4xf32> to vector<1x16x4xf32>
    %c0_227 = arith.constant 0 : index
    %816 = arith.index_cast %c14_i32_215 : i32 to index
    %c0_228 = arith.constant 0 : index
    %c0_229 = arith.constant 0 : index
    %817 = vector.load %arg7[%c0_227, %816, %c0_228, %c0_229] : memref<1x16x16x4xf32, #tpu.memory_space<vmem>>, vector<1x1x16x4xf32>
    %818 = vector.shape_cast %817 : vector<1x1x16x4xf32> to vector<1x16x4xf32>
    %819 = vector.shape_cast %815 : vector<1x16x4xf32> to vector<1x1x16x4xf32>
    tpu.vector_store %arg7[%c0_227, %816, %c0_228, %c0_229], %819 {strides = array<i32>} : memref<1x16x16x4xf32, #tpu.memory_space<vmem>>, vector<1x1x16x4xf32>,
    %c14_i32_230 = arith.constant 14 : i32
    %c16_i32_231 = arith.constant 16 : i32
    %820 = arith.addi %0, %c16_i32_231 : i32
    %c16_i32_232 = arith.constant 16 : i32
    %821 = arith.cmpi slt, %820, %c16_i32_232 : i32
    %c0_233 = arith.constant 0 : index
    %c0_234 = arith.constant 0 : index
    %c0_235 = arith.constant 0 : index
    %c0_236 = arith.constant 0 : index
    %822 = vector.load %arg4[%c0_233, %c0_234, %c0_235, %c0_236] : memref<1x1x16x4xf32, #tpu.memory_space<vmem>>, vector<1x1x16x4xf32>
    %823 = vector.shape_cast %822 : vector<1x1x16x4xf32> to vector<16x4xf32>
    %cst_237 = arith.constant 0.000000e+00 : f32
    %824 = vector.broadcast %cst_237 : f32 to vector<16x4xf32>
    %825 = arith.select %821, %823, %824 : vector<16x4xf32>
    %c1_i32_238 = arith.constant 1 : i32
    %826 = tpu.dynamic_rotate %825 by %c1_i32_238 dim 0 : vector<16x4xf32>, i32 -> vector<16x4xf32>
    %cst_239 = arith.constant 0.000000e+00 : f32
    %827 = vector.shape_cast %16 : vector<16x1xi1> to vector<16x1xi1>
    %828 = vector.broadcast %827 : vector<16x1xi1> to vector<16x4xi1>
    %829 = vector.broadcast %cst_239 : f32 to vector<16x4xf32>
    %830 = arith.select %828, %826, %829 : vector<16x4xi1>, vector<16x4xf32>
    %c15_i32_240 = arith.constant 15 : i32
    %831 = tpu.dynamic_rotate %825 by %c15_i32_240 dim 0 : vector<16x4xf32>, i32 -> vector<16x4xf32>
    %cst_241 = arith.constant 0.000000e+00 : f32
    %832 = vector.shape_cast %18 : vector<16x1xi1> to vector<16x1xi1>
    %833 = vector.broadcast %832 : vector<16x1xi1> to vector<16x4xi1>
    %834 = vector.broadcast %cst_241 : f32 to vector<16x4xf32>
    %835 = arith.select %833, %831, %834 : vector<16x4xi1>, vector<16x4xf32>
    %836 = vector.broadcast %6 : vector<1x4xf32> to vector<16x4xf32>
    %837 = arith.mulf %836, %777 : vector<16x4xf32>
    %838 = arith.addf %13, %837 : vector<16x4xf32>
    %839 = vector.broadcast %2 : vector<1x4xf32> to vector<16x4xf32>
    %840 = arith.mulf %839, %730 : vector<16x4xf32>
    %841 = arith.addf %838, %840 : vector<16x4xf32>
    %842 = vector.broadcast %3 : vector<1x4xf32> to vector<16x4xf32>
    %843 = arith.mulf %842, %725 : vector<16x4xf32>
    %844 = arith.addf %841, %843 : vector<16x4xf32>
    %845 = vector.broadcast %4 : vector<1x4xf32> to vector<16x4xf32>
    %846 = arith.mulf %845, %735 : vector<16x4xf32>
    %847 = arith.addf %844, %846 : vector<16x4xf32>
    %848 = vector.broadcast %5 : vector<1x4xf32> to vector<16x4xf32>
    %849 = arith.mulf %848, %782 : vector<16x4xf32>
    %850 = arith.addf %847, %849 : vector<16x4xf32>
    %851 = vector.broadcast %7 : vector<1x4xf32> to vector<16x4xf32>
    %852 = arith.mulf %851, %787 : vector<16x4xf32>
    %853 = arith.addf %850, %852 : vector<16x4xf32>
    %854 = vector.broadcast %8 : vector<1x4xf32> to vector<16x4xf32>
    %855 = arith.mulf %854, %830 : vector<16x4xf32>
    %856 = arith.addf %853, %855 : vector<16x4xf32>
    %857 = vector.broadcast %9 : vector<1x4xf32> to vector<16x4xf32>
    %858 = arith.mulf %857, %825 : vector<16x4xf32>
    %859 = arith.addf %856, %858 : vector<16x4xf32>
    %860 = vector.broadcast %10 : vector<1x4xf32> to vector<16x4xf32>
    %861 = arith.mulf %860, %835 : vector<16x4xf32>
    %862 = arith.addf %859, %861 : vector<16x4xf32>
    %c0_242 = arith.constant 0 : index
    %c15 = arith.constant 15 : index
    %c0_243 = arith.constant 0 : index
    %c0_244 = arith.constant 0 : index
    %863 = vector.load %arg7[%c0_242, %c15, %c0_243, %c0_244] : memref<1x16x16x4xf32, #tpu.memory_space<vmem>>, vector<1x1x16x4xf32>
    %864 = vector.shape_cast %863 : vector<1x1x16x4xf32> to vector<16x4xf32>
    %865 = vector.shape_cast %862 : vector<16x4xf32> to vector<1x1x16x4xf32>
    tpu.vector_store %arg7[%c0_242, %c15, %c0_243, %c0_244], %865 {strides = array<i32>} : memref<1x16x16x4xf32, #tpu.memory_space<vmem>>, vector<1x1x16x4xf32>,
    return
  }
  func.func @transform_0(%arg0: i32, %arg1: i32) -> (i32, i32, i32, i32) {
    %c0_i32 = arith.constant 0 : i32
    %c0_i32_0 = arith.constant 0 : i32
    %c0_i32_1 = arith.constant 0 : i32
    return %arg0, %arg1, %c0_i32, %c0_i32_0 : i32, i32, i32, i32
  }
  func.func @transform_1(%arg0: i32, %arg1: i32) -> (i32, i32, i32, i32) {
    %c16_i32 = arith.constant 16 : i32
    %0 = arith.muli %arg1, %c16_i32 : i32
    %c1_i32 = arith.constant 1 : i32
    %1 = arith.subi %0, %c1_i32 : i32
    %c0_i32 = arith.constant 0 : i32
    %2 = arith.maxsi %1, %c0_i32 : i32
    %c0_i32_0 = arith.constant 0 : i32
    %c0_i32_1 = arith.constant 0 : i32
    %c0_i32_2 = arith.constant 0 : i32
    return %arg0, %2, %c0_i32_0, %c0_i32_1 : i32, i32, i32, i32
  }
  func.func @transform_2(%arg0: i32, %arg1: i32) -> (i32, i32, i32, i32) {
    %c1_i32 = arith.constant 1 : i32
    %0 = arith.addi %arg1, %c1_i32 : i32
    %c16_i32 = arith.constant 16 : i32
    %1 = arith.muli %0, %c16_i32 : i32
    %c15_i32 = arith.constant 15 : i32
    %2 = arith.minsi %1, %c15_i32 : i32
    %c0_i32 = arith.constant 0 : i32
    %c0_i32_0 = arith.constant 0 : i32
    %c0_i32_1 = arith.constant 0 : i32
    return %arg0, %2, %c0_i32, %c0_i32_0 : i32, i32, i32, i32
  }
  func.func @transform_3(%arg0: i32, %arg1: i32) -> (i32, i32) {
    %c0_i32 = arith.constant 0 : i32
    %c0_i32_0 = arith.constant 0 : i32
    %c0_i32_1 = arith.constant 0 : i32
    return %c0_i32, %c0_i32_0 : i32, i32
  }
  func.func @transform_4(%arg0: i32, %arg1: i32) -> (i32, i32) {
    %c0_i32 = arith.constant 0 : i32
    %c0_i32_0 = arith.constant 0 : i32
    %c0_i32_1 = arith.constant 0 : i32
    return %c0_i32, %c0_i32_0 : i32, i32
  }
  func.func @transform_5(%arg0: i32, %arg1: i32) -> (i32, i32, i32, i32) {
    %c0_i32 = arith.constant 0 : i32
    %c0_i32_0 = arith.constant 0 : i32
    %c0_i32_1 = arith.constant 0 : i32
    return %arg0, %arg1, %c0_i32, %c0_i32_0 : i32, i32, i32, i32
  }
}

</mosaic_0001>

<bundles_post_ra>
// kernel: tpu_custom_call.1
= control target key start
LH: loop header
LB: loop body
LE: loop exit
PB: predicated region body
PF: predicated region fallthrough
CT: control target
= control target key end

     0   :  { %s1737_s18 = smov 0   ;;  %s1739_s19 = smov 0   ;;  %s2641_s0 = inlined_call_operand.vmem [shape: f32[2,16,16,4], index: 0, kind: input, shape index: {}]   ;;  %s2642_s1 = inlined_call_operand.vmem [shape: f32[2,16,16,4], index: 1, kind: input, shape index: {}]   ;;  %s2643_s2 = inlined_call_operand.vmem [shape: f32[2,16,16,4], index: 2, kind: input, shape index: {}]   ;;  %s2644_s3 = inlined_call_operand.vmem [shape: f32[9,4], index: 3, kind: input, shape index: {}]   ;;  %s2645_s4 = inlined_call_operand.vmem [shape: f32[1,4], index: 4, kind: input, shape index: {}]   ;;  %s2646_s5 = inlined_call_operand.vmem [shape: f32[2,16,16,4], index: 5, kind: output, shape index: {}]  }
   0x1   :  { %s1741_s20 = smov 0  }
   0x2 LB: > { %s27_s1 = sadd.s32 1, %s1700_s19  ;;  %p1577_p0 = scmp.ge.s32.totalorder %s1704_s20, 1  ;;  %s1704_s20 = sphi %s1741_s20, %s15_s20   ;;  %s1700_s19 = sphi %s1739_s19, %s2648_s19   ;;  %s1696_s18 = sphi %s1737_s18, %s2647_s18  }
   0x3   : > { %p29_p1 = scmp.ge.s32.totalorder %s27_s1, 2  ;;  %p273_p2 = scmp.lt.s32.totalorder %s1704_s20, 3 }
   0x5   : > { %s2650_s1 = smov (%p29_p1, %s27_s1), 0  ;;  %p274_p3 = pnand %p1577_p0, %p273_p2 }
   0x6   : > { %p338_p4 = scmp.lt.s32.totalorder (!%p274_p3), %s1696_s18, 1 }
   0x7   : > { %277 = sbr.rel (%p274_p3) target bundleno = 211 (0xd3), region = 40 }
   0xc   : > { %v394_v0 = vld [vmem:[%s2644_s3] sm:$0xff]  ;;  %v400_v1 = vlaneseq  ;;  %s2652_s18 = smov (!%p338_p4, %s1696_s18), 1  ;;  %v1706_v4 = vmov 0.0   ;;  %v1831_v32 = vld [vmem:[%s2644_s3 + $0x8] ss:$0 sm:$0xff]  ;;  %vm518_vm4 = vcmask 31744  }
   0xd   : > { %v1758_v2 = vperm.slane %v394_v0, 1  ;;  %v1764_v5 = vrot.slane %v1706_v4, 7  ;;  %v1766_v6 = vperm.slane %v394_v0, 4  ;;  %s1648_s22 = sshll.u32 %s2652_s18, 8  ;;  %v1770_v7 = vrot.slane %v1706_v4, 1 }
   0xe   : > { %v1762_v3 = vshrl.u32 %v400_v1, 7  ;;  %v1772_v8 = vperm.slane %v394_v0, 0  ;;  %v1774_v9 = vperm.slane %v394_v0, 2  ;;  %s1781_s25 = scalar_lea.vmem %s2641_s0, %s1648_s22  ;;  %v1786_v10 = vld [vmem:[%s2645_s4] ss:$0 sm:$0xff]  ;;  %v1792_v12 = vperm.slane %v394_v0, 3  ;;  %s1936_s7 = scalar_lea.vmem %s2646_s5, %s1648_s22 }
   0xf   : > { %v1790_v11 = vmul.f32 0.0, %v1758_v2  ;;  %v1794_v13 = vperm.slane %v394_v0, 5  ;;  %v1797_v14 = vld [vmem:[%s1781_s25] sm:$0xff]  ;;  %v1800_v15 = vld [vmem:[%s1781_s25 + $0x8] sm:$0xff]  ;;  %v1586_v16 = vld [vmem:[%s1781_s25 + $0x10] sm:$0xff]  ;;  %v1809_v18 = vperm.slane %v394_v0, 7 }
  0x10   : > { %vm403_vm0 = vcmp.ge.s32.totalorder %v1762_v3, 1  ;;  %vm429_vm1 = vcmp.lt.s32.totalorder %v1762_v3, 1  ;;  %vm440_vm2 = vcmp.lt.s32.totalorder %v1762_v3, 7  ;;  %v1812_v19 = vld [vmem:[%s1781_s25 + $0x18] sm:$0xff]  ;;  %v449_v20 = vrot.slane %v1797_v14, 7  ;;  %v1857_v45 = vld [vmem:[%s1781_s25 + $0x20] sm:$0xff] }
  0x11   : > { %v1806_v17 = vsel %vm403_vm0, %v1764_v5, 0.0  ;;  %v450_v21 = vrot.slane %v1800_v15, 7  ;;  %v455_v22 = vrot.slane %v1797_v14, 1  ;;  %v456_v23 = vrot.slane %v1800_v15, 1 }
  0x12   : > { %v461_v24 = vrot.slane %v1586_v16, 7  ;;  %v462_v25 = vrot.slane %v1812_v19, 7  ;;  %v467_v26 = vrot.slane %v1586_v16, 1  ;;  %v468_v27 = vrot.slane %v1812_v19, 1 }
  0x13   : > { %v452_v28 = vsel %vm429_vm1, %v450_v21, %v449_v20  ;;  %v474_v29 = vmul.f32 %v1766_v6, %v1797_v14  ;;  %v479_v30 = vmul.f32 %v1772_v8, %v1806_v17  ;;  %v1826_v31 = vperm.slane %v394_v0, 6 }
  0x14   : > { %v464_v33 = vsel %vm429_vm1, %v462_v25, %v461_v24  ;;  %v489_v34 = vmul.f32 %v1774_v9, %v1770_v7  ;;  %v1838_v35 = vadd.s32 8, %v1762_v3  ;;  %v480_v36 = vmul.f32 %v1772_v8, %v1764_v5 }
  0x15   : > { %v453_v37 = vsel %vm403_vm0, %v452_v28, 0.0  ;;  %v457_v38 = vsel %vm440_vm2, %v455_v22, %v456_v23  ;;  %v1848_v39 = vsel %vm403_vm0, %v464_v33, 0.0  ;;  %v476_v40 = vadd.f32 %v1786_v10, %v474_v29 }
  0x16   : > { %v469_v41 = vsel %vm440_vm2, %v467_v26, %v468_v27  ;;  %v494_v42 = vmul.f32 %v1792_v12, %v453_v37  ;;  %v499_v43 = vmul.f32 %v1794_v13, %v457_v38  ;;  %v509_v44 = vmul.f32 %v1586_v16, %v1809_v18 }
  0x17   : > { %v481_v46 = vadd.f32 %v479_v30, %v476_v40  ;;  %v514_v47 = vmul.f32 %v1831_v32, %v469_v41  ;;  %v604_v48 = vmul.f32 %v1857_v45, %v1766_v6  ;;  %v608_v49 = vmul.f32 %v1772_v8, %v1848_v39 }
  0x18   : > { %v504_v50 = vmul.f32 %v1826_v31, %v1848_v39  ;;  %v543_v51 = vmul.f32 %v1586_v16, %v1766_v6  ;;  %v547_v52 = vmul.f32 %v1772_v8, %v453_v37  ;;  %vm406_vm3 = vcmp.le.s32.totalorder %v1838_v35, 14 }
  0x19   : > { %v486_v53 = vadd.f32 %v1790_v11, %v481_v46  ;;  %v1871_v54 = vmul.f32 %v1774_v9, %v457_v38  ;;  %v606_v55 = vadd.f32 %v1786_v10, %v604_v48  ;;  %v458_v56 = vsel %vm440_vm2, %v456_v23, %v455_v22 }
  0x1a   : > { %v612_v57 = vmul.f32 %v1586_v16, %v1758_v2  ;;  %v1880_v58 = vsel %vm406_vm3, %v1770_v7, 0.0  ;;  %v470_v59 = vsel %vm440_vm2, %v468_v27, %v467_v26  ;;  %v475_v60 = vmul.f32 %v1766_v6, %v1800_v15 }
  0x1b   : > { %v491_v61 = vadd.f32 %v489_v34, %v486_v53  ;;  %v1887_v62 = vmul.f32 %v1794_v13, %v469_v41  ;;  %v610_v63 = vadd.f32 %v608_v49, %v606_v55  ;;  %v616_v0 = vmul.f32 %v1774_v9, %v469_v41 }
  0x1c   : > { %v451_v1 = vsel %vm429_vm1, %v449_v20, %v450_v21  ;;  %v460_v4 = vsel %vm406_vm3, %v458_v56, 0.0  ;;  %v1896_v16 = vsel %vm429_vm1, %v461_v24, %v462_v25  ;;  %v477_v22 = vadd.f32 %v1786_v10, %v475_v60  ;;  %v1908_v24 = vld [vmem:[%s1781_s25 + $0x28] sm:$0xff] }
  0x1d   : > { %v496_v23 = vadd.f32 %v494_v42, %v491_v61  ;;  %v472_v26 = vsel %vm406_vm3, %v470_v59, 0.0  ;;  %v490_v27 = vmul.f32 %v1774_v9, %v1880_v58  ;;  %v495_v28 = vmul.f32 %v1792_v12, %v451_v1 }
  0x1e   : > { %v614_v29 = vadd.f32 %v612_v57, %v610_v63  ;;  %v482_v20 = vadd.f32 %v480_v36, %v477_v22  ;;  %v500_v21 = vmul.f32 %v1794_v13, %v460_v4  ;;  %v505_v30 = vmul.f32 %v1826_v31, %v1896_v16 }
  0x1f   : > { %v501_v25 = vadd.f32 %v499_v43, %v496_v23  ;;  %v510_v33 = vmul.f32 %v1812_v19, %v1809_v18  ;;  %v605_v34 = vmul.f32 %v1908_v24, %v1766_v6  ;;  %v609_v37 = vmul.f32 %v1772_v8, %v1896_v16 }
  0x20   : > { %v487_v38 = vadd.f32 %v1790_v11, %v482_v20  ;;  %v515_v36 = vmul.f32 %v1831_v32, %v472_v26  ;;  %v548_v40 = vmul.f32 %v1772_v8, %v451_v1  ;;  %v531_v41 = vrot.slane %v1857_v45, 7 }
  0x21   : > { %v506_v42 = vadd.f32 %v504_v50, %v501_v25  ;;  %v607_v43 = vadd.f32 %v1786_v10, %v605_v34  ;;  %v613_v46 = vmul.f32 %v1812_v19, %v1758_v2  ;;  %v532_v48 = vrot.slane %v1908_v24, 7 }
  0x22   : > { %v492_v49 = vadd.f32 %v490_v27, %v487_v38  ;;  %v537_v53 = vrot.slane %v1857_v45, 1  ;;  %v545_v11 = vadd.f32 %v1786_v10, %v543_v51  ;;  %v551_v55 = vmul.f32 %v1758_v2, %v1797_v14 }
  0x23   : > { %v511_v56 = vadd.f32 %v509_v44, %v506_v42  ;;  %v611_v57 = vadd.f32 %v609_v37, %v607_v43  ;;  %v534_v50 = vsel %vm429_vm1, %v532_v48, %v531_v41  ;;  %v538_v59 = vrot.slane %v1908_v24, 1 }
  0x24   : > { %v497_v60 = vadd.f32 %v495_v28, %v492_v49  ;;  %v556_v51 = vmul.f32 %v1774_v9, %v460_v4  ;;  %v1940_v14 = vmul.f32 %v1794_v13, %v472_v26  ;;  %v549_v44 = vadd.f32 %v547_v52, %v545_v11  ;;  %v1948_v28 = vld [vmem:[%s1781_s25 + $0x30] sm:$0xff] }
  0x25   : > { %v516_v61 = vadd.f32 %v514_v47, %v511_v56  ;;  %v618_v63 = vadd.f32 %v616_v0, %v614_v29  ;;  %v617_v1 = vmul.f32 %v1774_v9, %v472_v26  ;;  %v535_v22 = vsel %vm403_vm0, %v534_v50, 0.0  ;;  %v1982_v50 = vld [vmem:[%s1781_s25 + $0x38] sm:$0xff] }
  0x26   : > { %v502_v23 = vadd.f32 %v500_v21, %v497_v60  ;;  %v615_v27 = vadd.f32 %v613_v46, %v611_v57  ;;  %v553_v20 = vadd.f32 %v551_v55, %v549_v44  ;;  %v559_v25 = vmul.f32 %v1792_v12, %v1848_v39 }
  0x27   : > { %519 = vst.msk [vmem:[%s1936_s7] sm:$0xff] %vm518_vm4, %v516_v61  ;;  %v539_v52 = vsel %vm440_vm2, %v537_v53, %v538_v59  ;;  %v567_v47 = vmul.f32 %v535_v22, %v1826_v31  ;;  %v571_v0 = vmul.f32 %v1857_v45, %v1809_v18  ;;  %v665_v4 = vmul.f32 %v1948_v28, %v1766_v6 }
  0x28   : > { %v507_v26 = vadd.f32 %v505_v30, %v502_v23  ;;  %v557_v29 = vadd.f32 %v1871_v54, %v553_v20  ;;  %v575_v39 = vmul.f32 %v1831_v32, %v539_v52  ;;  %v669_v21 = vmul.f32 %v535_v22, %v1772_v8 }
  0x29   : > { %v624_v34 = vmul.f32 %v539_v52, %v1794_v13  ;;  %v667_v37 = vadd.f32 %v1786_v10, %v665_v4  ;;  %v540_v38 = vsel %vm440_vm2, %v538_v59, %v537_v53  ;;  %v544_v42 = vmul.f32 %v1812_v19, %v1766_v6 }
  0x2a   : > { %v512_v43 = vadd.f32 %v510_v33, %v507_v26  ;;  %v1968_v46 = vadd.f32 %v617_v1, %v615_v27  ;;  %v561_v54 = vadd.f32 %v559_v25, %v557_v29  ;;  %v533_v30 = vsel %vm429_vm1, %v531_v41, %v532_v48 }
  0x2b   : > { %v673_v49 = vmul.f32 %v1857_v45, %v1758_v2  ;;  %v677_v11 = vmul.f32 %v539_v52, %v1774_v9  ;;  %v546_v55 = vadd.f32 %v1786_v10, %v544_v42  ;;  %v552_v53 = vmul.f32 %v1758_v2, %v1800_v15 }
  0x2c   : > { %v517_v56 = vadd.f32 %v515_v36, %v512_v43  ;;  %v565_v19 = vadd.f32 %v1887_v62, %v561_v54  ;;  %v671_v33 = vadd.f32 %v669_v21, %v667_v37  ;;  %v542_v57 = vsel %vm406_vm3, %v540_v38, 0.0 }
  0x2d   : > { %v550_v41 = vadd.f32 %v548_v40, %v546_v55  ;;  %v560_v45 = vmul.f32 %v1792_v12, %v1896_v16  ;;  %v666_v48 = vmul.f32 %v1982_v50, %v1766_v6  ;;  %v670_v59 = vmul.f32 %v533_v30, %v1772_v8 }
  0x2e   : > { %520 = vst.msk [vmem:[%s1936_s7 + $0x8] sm:$0xff] %vm518_vm4, %v517_v56  ;;  %v569_v15 = vadd.f32 %v567_v47, %v565_v19  ;;  %v568_v62 = vmul.f32 %v533_v30, %v1826_v31  ;;  %v572_v36 = vmul.f32 %v1908_v24, %v1809_v18  ;;  %v592_v60 = vrot.slane %v1948_v28, 7 }
  0x2f   : > { %v554_v44 = vadd.f32 %v552_v53, %v550_v41  ;;  %v668_v40 = vadd.f32 %v1786_v10, %v666_v48  ;;  %v674_v16 = vmul.f32 %v1908_v24, %v1758_v2  ;;  %v593_v61 = vrot.slane %v1982_v50, 7 }
  0x30   : > { %v573_v1 = vadd.f32 %v571_v0, %v569_v15  ;;  %v675_v23 = vadd.f32 %v673_v49, %v671_v33  ;;  %v598_v27 = vrot.slane %v1948_v28, 1  ;;  %v620_v20 = vmul.f32 %v535_v22, %v1792_v12 }
  0x31   : > { %v558_v25 = vadd.f32 %v556_v51, %v554_v44  ;;  %v672_v52 = vadd.f32 %v670_v59, %v668_v40  ;;  %v595_v47 = vsel %vm429_vm1, %v593_v61, %v592_v60  ;;  %v599_v4 = vrot.slane %v1982_v50, 1  ;;  %v2010_v51 = vld [vmem:[%s1781_s25 + $0x40] sm:$0xff]  ;;  %v2034_v44 = vld [vmem:[%s1781_s25 + $0x48] sm:$0xff] }
  0x32   : > { %v577_v26 = vadd.f32 %v575_v39, %v573_v1  ;;  %v576_v24 = vmul.f32 %v1831_v32, %v542_v57  ;;  %v596_v0 = vsel %vm403_vm0, %v595_v47, 0.0  ;;  %v622_v29 = vadd.f32 %v620_v20, %v618_v63 }
  0x33   : > { %v562_v21 = vadd.f32 %v560_v45, %v558_v25  ;;  %v676_v37 = vadd.f32 %v674_v16, %v672_v52  ;;  %v678_v38 = vmul.f32 %v542_v57, %v1774_v9  ;;  %v628_v22 = vmul.f32 %v596_v0, %v1826_v31 }
  0x34   : > { %1590 = vst.msk [vmem:[%s1936_s7 + $0x10] sm:$0xff] %vm518_vm4, %v577_v26  ;;  %v626_v42 = vadd.f32 %v624_v34, %v622_v29  ;;  %v632_v39 = vmul.f32 %v1948_v28, %v1809_v18  ;;  %v726_v43 = vmul.f32 %v2010_v51, %v1766_v6  ;;  %v730_v54 = vmul.f32 %v596_v0, %v1772_v8 }
  0x35   : > { %v679_v63 = vadd.f32 %v677_v11, %v675_v23  ;;  %v566_v49 = vadd.f32 %v1940_v14, %v562_v21  ;;  %v625_v55 = vmul.f32 %v542_v57, %v1794_v13  ;;  %v600_v53 = vsel %vm440_vm2, %v598_v27, %v599_v4  ;;  %v2058_v21 = vld [vmem:[%s1781_s25 + $0x50] sm:$0xff] }
  0x36   : > { %v630_v56 = vadd.f32 %v628_v22, %v626_v42  ;;  %v636_v34 = vmul.f32 %v1831_v32, %v600_v53  ;;  %v685_v19 = vmul.f32 %v600_v53, %v1794_v13  ;;  %v728_v33 = vadd.f32 %v1786_v10, %v726_v43 }
  0x37   : > { %v570_v41 = vadd.f32 %v568_v62, %v566_v49  ;;  %v680_v45 = vadd.f32 %v678_v38, %v676_v37  ;;  %v601_v11 = vsel %vm440_vm2, %v599_v4, %v598_v27  ;;  %v621_v48 = vmul.f32 %v533_v30, %v1792_v12 }
  0x38   : > { %v634_v14 = vadd.f32 %v632_v39, %v630_v56  ;;  %v732_v59 = vadd.f32 %v730_v54, %v728_v33  ;;  %v734_v57 = vmul.f32 %v1948_v28, %v1758_v2  ;;  %v594_v15 = vsel %vm429_vm1, %v592_v60, %v593_v61 }
  0x39   : > { %v574_v40 = vadd.f32 %v572_v36, %v570_v41  ;;  %v623_v62 = vadd.f32 %v621_v48, %v1968_v46  ;;  %v629_v16 = vmul.f32 %v594_v15, %v1826_v31  ;;  %v727_v30 = vmul.f32 %v2034_v44, %v1766_v6 }
  0x3a   : > { %v638_v1 = vadd.f32 %v636_v34, %v634_v14  ;;  %v738_v23 = vmul.f32 %v600_v53, %v1774_v9  ;;  %v603_v28 = vsel %vm406_vm3, %v601_v11, 0.0  ;;  %v633_v60 = vmul.f32 %v1982_v50, %v1809_v18 }
  0x3b   : > { %v578_v61 = vadd.f32 %v576_v24, %v574_v40  ;;  %v627_v36 = vadd.f32 %v625_v55, %v623_v62  ;;  %v729_v46 = vadd.f32 %v1786_v10, %v727_v30  ;;  %v731_v27 = vmul.f32 %v594_v15, %v1772_v8 }
  0x3c   : > { %1594 = vst.msk [vmem:[%s1936_s7 + $0x20] sm:$0xff] %vm518_vm4, %v638_v1  ;;  %v736_v20 = vadd.f32 %v734_v57, %v732_v59  ;;  %v637_v25 = vmul.f32 %v1831_v32, %v603_v28  ;;  %v653_v52 = vrot.slane %v2010_v51, 7  ;;  %v654_v47 = vrot.slane %v2034_v44, 7  ;;  %v2092_v1 = vld [vmem:[%s1781_s25 + $0x58] sm:$0xff] }
  0x3d   : > { %1591 = vst.msk [vmem:[%s1936_s7 + $0x18] sm:$0xff] %vm518_vm4, %v578_v61  ;;  %v631_v4 = vadd.f32 %v629_v16, %v627_v36  ;;  %v659_v26 = vrot.slane %v2010_v51, 1  ;;  %v660_v24 = vrot.slane %v2034_v44, 1  ;;  %v681_v29 = vmul.f32 %v596_v0, %v1792_v12 }
  0x3e   : > { %v686_v37 = vmul.f32 %v603_v28, %v1794_v13  ;;  %v735_v38 = vmul.f32 %v1982_v50, %v1758_v2  ;;  %v656_v22 = vsel %vm429_vm1, %v654_v47, %v653_v52  ;;  %v787_v42 = vmul.f32 %v2058_v21, %v1766_v6 }
  0x3f   : > { %v635_v39 = vadd.f32 %v633_v60, %v631_v4  ;;  %v733_v43 = vadd.f32 %v731_v27, %v729_v46  ;;  %v739_v54 = vmul.f32 %v603_v28, %v1774_v9  ;;  %v657_v0 = vsel %vm403_vm0, %v656_v22, 0.0 }
  0x40   : > { %v740_v49 = vadd.f32 %v738_v23, %v736_v20  ;;  %v683_v55 = vadd.f32 %v681_v29, %v679_v63  ;;  %v689_v53 = vmul.f32 %v657_v0, %v1826_v31  ;;  %v693_v50 = vmul.f32 %v2010_v51, %v1809_v18 }
  0x41   : > { %v639_v56 = vadd.f32 %v637_v25, %v635_v39  ;;  %v661_v34 = vsel %vm440_vm2, %v659_v26, %v660_v24  ;;  %v789_v33 = vadd.f32 %v1786_v10, %v787_v42  ;;  %v791_v41 = vmul.f32 %v657_v0, %v1772_v8  ;;  %v2112_v42 = vld [vmem:[%s1781_s25 + $0x60] sm:$0xff] }
  0x42   : > { %v687_v11 = vadd.f32 %v685_v19, %v683_v55  ;;  %v795_v48 = vmul.f32 %v2010_v51, %v1758_v2  ;;  %v655_v63 = vsel %vm429_vm1, %v653_v52, %v654_v47  ;;  %v662_v14 = vsel %vm440_vm2, %v660_v24, %v659_v26 }
  0x43   : > { %1595 = vst.msk [vmem:[%s1936_s7 + $0x28] sm:$0xff] %vm518_vm4, %v639_v56  ;;  %v737_v59 = vadd.f32 %v735_v38, %v733_v43  ;;  %v697_v57 = vmul.f32 %v1831_v32, %v661_v34  ;;  %v746_v40 = vmul.f32 %v661_v34, %v1794_v13  ;;  %v682_v62 = vmul.f32 %v594_v15, %v1792_v12 }
  0x44   : > { %v691_v16 = vadd.f32 %v689_v53, %v687_v11  ;;  %v793_v19 = vadd.f32 %v791_v41, %v789_v33  ;;  %v799_v30 = vmul.f32 %v661_v34, %v1774_v9  ;;  %v664_v51 = vsel %vm406_vm3, %v662_v14, 0.0 }
  0x45   : > { %v684_v23 = vadd.f32 %v682_v62, %v680_v45  ;;  %v690_v28 = vmul.f32 %v655_v63, %v1826_v31  ;;  %v788_v60 = vmul.f32 %v2092_v1, %v1766_v6  ;;  %v792_v61 = vmul.f32 %v655_v63, %v1772_v8 }
  0x46   : > { %v695_v36 = vadd.f32 %v693_v50, %v691_v16  ;;  %v694_v15 = vmul.f32 %v2034_v44, %v1809_v18  ;;  %v698_v46 = vmul.f32 %v1831_v32, %v664_v51  ;;  %v714_v27 = vrot.slane %v2058_v21, 7 }
  0x47   : > { %v688_v20 = vadd.f32 %v686_v37, %v684_v23  ;;  %v790_v45 = vadd.f32 %v1786_v10, %v788_v60  ;;  %v796_v25 = vmul.f32 %v2034_v44, %v1758_v2  ;;  %v715_v52 = vrot.slane %v2092_v1, 7 }
  0x48   : > { %v699_v47 = vadd.f32 %v697_v57, %v695_v36  ;;  %v720_v4 = vrot.slane %v2058_v21, 1  ;;  %v721_v26 = vrot.slane %v2092_v1, 1  ;;  %v742_v24 = vmul.f32 %v657_v0, %v1792_v12 }
  0x49   : > { %v797_v29 = vadd.f32 %v795_v48, %v793_v19  ;;  %v692_v38 = vadd.f32 %v690_v28, %v688_v20  ;;  %v794_v22 = vadd.f32 %v792_v61, %v790_v45  ;;  %v717_v37 = vsel %vm429_vm1, %v715_v52, %v714_v27 }
  0x4a   : > { %1598 = vst.msk [vmem:[%s1936_s7 + $0x30] sm:$0xff] %vm518_vm4, %v699_v47  ;;  %v800_v44 = vmul.f32 %v664_v51, %v1774_v9  ;;  %v718_v39 = vsel %vm403_vm0, %v717_v37, 0.0  ;;  %v744_v43 = vadd.f32 %v742_v24, %v740_v49  ;;  %v848_v55 = vmul.f32 %v2112_v42, %v1766_v6  ;;  %v2154_v24 = vld [vmem:[%s1781_s25 + $0x70] sm:$0xff] }
  0x4b   : > { %v696_v0 = vadd.f32 %v694_v15, %v692_v38  ;;  %v722_v53 = vsel %vm440_vm2, %v720_v4, %v721_v26  ;;  %v750_v50 = vmul.f32 %v718_v39, %v1826_v31  ;;  %v754_v56 = vmul.f32 %v2058_v21, %v1809_v18  ;;  %v1605_v15 = vld [vmem:[%s1781_s25 + $0x68] sm:$0xff] }
  0x4c   : > { %v798_v34 = vadd.f32 %v796_v25, %v794_v22  ;;  %v748_v33 = vadd.f32 %v746_v40, %v744_v43  ;;  %v850_v41 = vadd.f32 %v1786_v10, %v848_v55  ;;  %v852_v11 = vmul.f32 %v718_v39, %v1772_v8 }
  0x4d   : > { %v741_v49 = vadd.f32 %v739_v54, %v737_v59  ;;  %v700_v48 = vadd.f32 %v698_v46, %v696_v0  ;;  %v758_v14 = vmul.f32 %v1831_v32, %v722_v53  ;;  %v856_v57 = vmul.f32 %v2058_v21, %v1758_v2 }
  0x4e   : > { %v752_v62 = vadd.f32 %v750_v50, %v748_v33  ;;  %v854_v16 = vadd.f32 %v852_v11, %v850_v41  ;;  %v716_v19 = vsel %vm429_vm1, %v714_v27, %v715_v52  ;;  %v723_v40 = vsel %vm440_vm2, %v721_v26, %v720_v4 }
  0x4f   : > { %v801_v23 = vadd.f32 %v799_v30, %v797_v29  ;;  %1599 = vst.msk [vmem:[%s1936_s7 + $0x38] sm:$0xff] %vm518_vm4, %v700_v48  ;;  %v747_v54 = vmul.f32 %v664_v51, %v1794_v13  ;;  %v807_v59 = vmul.f32 %v722_v53, %v1794_v13  ;;  %v743_v28 = vmul.f32 %v655_v63, %v1792_v12 }
  0x50   : > { %v802_v60 = vadd.f32 %v800_v44, %v798_v34  ;;  %v756_v61 = vadd.f32 %v754_v56, %v752_v62  ;;  %v860_v21 = vmul.f32 %v722_v53, %v1774_v9  ;;  %v725_v36 = vsel %vm406_vm3, %v723_v40, 0.0 }
  0x51   : > { %v745_v46 = vadd.f32 %v743_v28, %v741_v49  ;;  %v751_v30 = vmul.f32 %v716_v19, %v1826_v31  ;;  %v849_v27 = vmul.f32 %v1605_v15, %v1766_v6  ;;  %v853_v51 = vmul.f32 %v716_v19, %v1772_v8 }
  0x52   : > { %v760_v20 = vadd.f32 %v758_v14, %v756_v61  ;;  %v858_v45 = vadd.f32 %v856_v57, %v854_v16  ;;  %v755_v63 = vmul.f32 %v2092_v1, %v1809_v18  ;;  %v775_v25 = vrot.slane %v2112_v42, 7 }
  0x53   : > { %v749_v52 = vadd.f32 %v747_v54, %v745_v46  ;;  %v851_v47 = vadd.f32 %v1786_v10, %v849_v27  ;;  %v857_v4 = vmul.f32 %v2092_v1, %v1758_v2  ;;  %v776_v26 = vrot.slane %v1605_v15, 7 }
  0x54   : > { %1602 = vst.msk [vmem:[%s1936_s7 + $0x40] sm:$0xff] %vm518_vm4, %v760_v20  ;;  %v781_v29 = vrot.slane %v2112_v42, 1  ;;  %v782_v38 = vrot.slane %v1605_v15, 1  ;;  %v803_v22 = vmul.f32 %v718_v39, %v1792_v12  ;;  %v909_v37 = vmul.f32 %v2154_v24, %v1766_v6 }
  0x55   : > { %v753_v44 = vadd.f32 %v751_v30, %v749_v52  ;;  %v759_v43 = vmul.f32 %v1831_v32, %v725_v36  ;;  %v855_v55 = vadd.f32 %v853_v51, %v851_v47  ;;  %v778_v1 = vsel %vm429_vm1, %v776_v26, %v775_v25  ;;  %v1609_v30 = vld [vmem:[%s1781_s25 + $0x78] sm:$0xff] }
  0x56   : > { %v808_v0 = vmul.f32 %v725_v36, %v1794_v13  ;;  %v861_v53 = vmul.f32 %v725_v36, %v1774_v9  ;;  %v779_v50 = vsel %vm403_vm0, %v778_v1, 0.0  ;;  %v805_v56 = vadd.f32 %v803_v22, %v801_v23 }
  0x57   : > { %v757_v34 = vadd.f32 %v755_v63, %v753_v44  ;;  %v859_v39 = vadd.f32 %v857_v4, %v855_v55  ;;  %v811_v33 = vmul.f32 %v779_v50, %v1826_v31  ;;  %v911_v41 = vadd.f32 %v1786_v10, %v909_v37  ;;  %v2201_v37 = vld [vmem:[%s1781_s25 + $0x80] sm:$0xff] }
  0x58   : > { %v783_v11 = vsel %vm440_vm2, %v781_v29, %v782_v38  ;;  %v809_v49 = vadd.f32 %v807_v59, %v805_v56  ;;  %v815_v48 = vmul.f32 %v2112_v42, %v1809_v18  ;;  %v913_v14 = vmul.f32 %v779_v50, %v1772_v8 }
  0x59   : > { %v862_v57 = vadd.f32 %v860_v21, %v858_v45  ;;  %v761_v62 = vadd.f32 %v759_v43, %v757_v34  ;;  %v819_v16 = vmul.f32 %v1831_v32, %v783_v11  ;;  %v917_v40 = vmul.f32 %v2112_v42, %v1758_v2 }
  0x5a   : > { %v813_v23 = vadd.f32 %v811_v33, %v809_v49  ;;  %v777_v54 = vsel %vm429_vm1, %v775_v25, %v776_v26  ;;  %v784_v59 = vsel %vm440_vm2, %v782_v38, %v781_v29  ;;  %v804_v28 = vmul.f32 %v716_v19, %v1792_v12 }
  0x5b   : > { %1603 = vst.msk [vmem:[%s1936_s7 + $0x48] sm:$0xff] %vm518_vm4, %v761_v62  ;;  %v863_v61 = vadd.f32 %v861_v53, %v859_v39  ;;  %v868_v21 = vmul.f32 %v783_v11, %v1794_v13  ;;  %v915_v36 = vadd.f32 %v913_v14, %v911_v41  ;;  %v921_v46 = vmul.f32 %v783_v11, %v1774_v9 }
  0x5c   : > { %v817_v27 = vadd.f32 %v815_v48, %v813_v23  ;;  %v806_v42 = vadd.f32 %v804_v28, %v802_v60  ;;  %v812_v51 = vmul.f32 %v777_v54, %v1826_v31  ;;  %v910_v20 = vmul.f32 %v1609_v30, %v1766_v6 }
  0x5d   : > { %v786_v19 = vsel %vm406_vm3, %v784_v59, 0.0  ;;  %v816_v45 = vmul.f32 %v1605_v15, %v1809_v18  ;;  %v914_v63 = vmul.f32 %v777_v54, %v1772_v8  ;;  %v836_v25 = vrot.slane %v2154_v24, 7 }
  0x5e   : > { %v821_v52 = vadd.f32 %v819_v16, %v817_v27  ;;  %v810_v47 = vadd.f32 %v808_v0, %v806_v42  ;;  %v912_v4 = vadd.f32 %v1786_v10, %v910_v20  ;;  %v918_v60 = vmul.f32 %v1605_v15, %v1758_v2 }
  0x5f   : > { %v837_v26 = vrot.slane %v1609_v30, 7  ;;  %v842_v29 = vrot.slane %v2154_v24, 1  ;;  %v843_v38 = vrot.slane %v1609_v30, 1  ;;  %v864_v22 = vmul.f32 %v779_v50, %v1792_v12 }
  0x60   : > { %1606 = vst.msk [vmem:[%s1936_s7 + $0x50] sm:$0xff] %vm518_vm4, %v821_v52  ;;  %v814_v44 = vadd.f32 %v812_v51, %v810_v47  ;;  %v820_v43 = vmul.f32 %v1831_v32, %v786_v19  ;;  %v916_v55 = vadd.f32 %v914_v63, %v912_v4  ;;  %v970_v1 = vmul.f32 %v2201_v37, %v1766_v6  ;;  %v1613_v63 = vld [vmem:[%s1781_s25 + $0x88] sm:$0xff] }
  0x61   : > { %v919_v0 = vadd.f32 %v917_v40, %v915_v36  ;;  %v869_v15 = vmul.f32 %v786_v19, %v1794_v13  ;;  %v839_v53 = vsel %vm429_vm1, %v837_v26, %v836_v25  ;;  %v866_v56 = vadd.f32 %v864_v22, %v862_v57 }
  0x62   : > { %v818_v34 = vadd.f32 %v816_v45, %v814_v44  ;;  %v920_v50 = vadd.f32 %v918_v60, %v916_v55  ;;  %v922_v39 = vmul.f32 %v786_v19, %v1774_v9  ;;  %v840_v33 = vsel %vm403_vm0, %v839_v53, 0.0 }
  0x63   : > { %v844_v41 = vsel %vm440_vm2, %v842_v29, %v843_v38  ;;  %v870_v11 = vadd.f32 %v868_v21, %v866_v56  ;;  %v872_v49 = vmul.f32 %v840_v33, %v1826_v31  ;;  %v876_v48 = vmul.f32 %v2154_v24, %v1809_v18 }
  0x64   : > { %v822_v14 = vadd.f32 %v820_v43, %v818_v34  ;;  %v880_v57 = vmul.f32 %v1831_v32, %v844_v41  ;;  %v972_v62 = vadd.f32 %v1786_v10, %v970_v1  ;;  %v974_v16 = vmul.f32 %v840_v33, %v1772_v8  ;;  %v2249_v1 = vld [vmem:[%s1781_s25 + $0x90] sm:$0xff] }
  0x65   : > { %v874_v40 = vadd.f32 %v872_v49, %v870_v11  ;;  %v838_v23 = vsel %vm429_vm1, %v836_v25, %v837_v26  ;;  %v845_v59 = vsel %vm440_vm2, %v843_v38, %v842_v29  ;;  %v865_v28 = vmul.f32 %v777_v54, %v1792_v12 }
  0x66   : > { %v923_v21 = vadd.f32 %v921_v46, %v919_v0  ;;  %1607 = vst.msk [vmem:[%s1936_s7 + $0x58] sm:$0xff] %vm518_vm4, %v822_v14  ;;  %v924_v36 = vadd.f32 %v922_v39, %v920_v50  ;;  %v929_v27 = vmul.f32 %v844_v41, %v1794_v13  ;;  %v978_v42 = vmul.f32 %v2154_v24, %v1758_v2 }
  0x67   : > { %v878_v51 = vadd.f32 %v876_v48, %v874_v40  ;;  %v982_v20 = vmul.f32 %v844_v41, %v1774_v9  ;;  %v867_v19 = vadd.f32 %v865_v28, %v863_v61  ;;  %v873_v45 = vmul.f32 %v838_v23, %v1826_v31 }
  0x68   : > { %v976_v25 = vadd.f32 %v974_v16, %v972_v62  ;;  %v847_v54 = vsel %vm406_vm3, %v845_v59, 0.0  ;;  %v971_v46 = vmul.f32 %v1613_v63, %v1766_v6  ;;  %v975_v52 = vmul.f32 %v838_v23, %v1772_v8 }
  0x69   : > { %v882_v47 = vadd.f32 %v880_v57, %v878_v51  ;;  %v871_v4 = vadd.f32 %v869_v15, %v867_v19  ;;  %v877_v24 = vmul.f32 %v1609_v30, %v1809_v18  ;;  %v897_v60 = vrot.slane %v2201_v37, 7 }
  0x6a   : > { %v973_v61 = vadd.f32 %v1786_v10, %v971_v46  ;;  %v979_v26 = vmul.f32 %v1609_v30, %v1758_v2  ;;  %v898_v29 = vrot.slane %v1613_v63, 7  ;;  %v903_v38 = vrot.slane %v2201_v37, 1 }
  0x6b   : > { %1610 = vst.msk [vmem:[%s1936_s7 + $0x60] sm:$0xff] %vm518_vm4, %v882_v47  ;;  %v875_v22 = vadd.f32 %v873_v45, %v871_v4  ;;  %v881_v44 = vmul.f32 %v1831_v32, %v847_v54  ;;  %v904_v43 = vrot.slane %v1613_v63, 1  ;;  %v925_v55 = vmul.f32 %v840_v33, %v1792_v12 }
  0x6c   : > { %v980_v0 = vadd.f32 %v978_v42, %v976_v25  ;;  %v977_v15 = vadd.f32 %v975_v52, %v973_v61  ;;  %v900_v53 = vsel %vm429_vm1, %v898_v29, %v897_v60  ;;  %v1031_v30 = vmul.f32 %v2249_v1, %v1766_v6 }
  0x6d   : > { %v879_v56 = vadd.f32 %v877_v24, %v875_v22  ;;  %v983_v34 = vmul.f32 %v847_v54, %v1774_v9  ;;  %v901_v50 = vsel %vm403_vm0, %v900_v53, 0.0  ;;  %v927_v39 = vadd.f32 %v925_v55, %v923_v21  ;;  %v2291_v55 = vld [vmem:[%s1781_s25 + $0xa0] sm:$0xff] }
  0x6e   : > { %v981_v41 = vadd.f32 %v979_v26, %v977_v15  ;;  %v905_v33 = vsel %vm440_vm2, %v903_v38, %v904_v43  ;;  %v933_v11 = vmul.f32 %v901_v50, %v1826_v31  ;;  %v937_v49 = vmul.f32 %v2201_v37, %v1809_v18 }
  0x6f   : > { %v883_v48 = vadd.f32 %v881_v44, %v879_v56  ;;  %v931_v14 = vadd.f32 %v929_v27, %v927_v39  ;;  %v1033_v57 = vadd.f32 %v1786_v10, %v1031_v30  ;;  %v1035_v62 = vmul.f32 %v901_v50, %v1772_v8 }
  0x70   : > { %v984_v16 = vadd.f32 %v982_v20, %v980_v0  ;;  %v930_v40 = vmul.f32 %v847_v54, %v1794_v13  ;;  %v941_v59 = vmul.f32 %v1831_v32, %v905_v33  ;;  %v1039_v28 = vmul.f32 %v2201_v37, %v1758_v2  ;;  %v1617_v54 = vld [vmem:[%s1781_s25 + $0x98] sm:$0xff] }
  0x71   : > { %1611 = vst.msk [vmem:[%s1936_s7 + $0x68] sm:$0xff] %vm518_vm4, %v883_v48  ;;  %v935_v21 = vadd.f32 %v933_v11, %v931_v14  ;;  %v899_v42 = vsel %vm429_vm1, %v897_v60, %v898_v29  ;;  %v906_v27 = vsel %vm440_vm2, %v904_v43, %v903_v38  ;;  %v926_v51 = vmul.f32 %v838_v23, %v1792_v12 }
  0x72   : > { %v985_v19 = vadd.f32 %v983_v34, %v981_v41  ;;  %v990_v20 = vmul.f32 %v905_v33, %v1794_v13  ;;  %v1037_v45 = vadd.f32 %v1035_v62, %v1033_v57  ;;  %v1043_v25 = vmul.f32 %v905_v33, %v1774_v9 }
  0x73   : > { %v939_v46 = vadd.f32 %v937_v49, %v935_v21  ;;  %v928_v37 = vadd.f32 %v926_v51, %v924_v36  ;;  %v934_v52 = vmul.f32 %v899_v42, %v1826_v31  ;;  %v1032_v47 = vmul.f32 %v1617_v54, %v1766_v6 }
  0x74   : > { %v908_v4 = vsel %vm406_vm3, %v906_v27, 0.0  ;;  %v938_v23 = vmul.f32 %v1613_v63, %v1809_v18  ;;  %v1036_v24 = vmul.f32 %v899_v42, %v1772_v8  ;;  %v958_v60 = vrot.slane %v2249_v1, 7 }
  0x75   : > { %v943_v61 = vadd.f32 %v941_v59, %v939_v46  ;;  %v932_v26 = vadd.f32 %v930_v40, %v928_v37  ;;  %v1034_v29 = vadd.f32 %v1786_v10, %v1032_v47  ;;  %v1040_v36 = vmul.f32 %v1613_v63, %v1758_v2 }
  0x76   : > { %v959_v38 = vrot.slane %v1617_v54, 7  ;;  %v964_v22 = vrot.slane %v2249_v1, 1  ;;  %v965_v44 = vrot.slane %v1617_v54, 1  ;;  %v986_v43 = vmul.f32 %v901_v50, %v1792_v12 }
  0x77   : > { %1614 = vst.msk [vmem:[%s1936_s7 + $0x70] sm:$0xff] %vm518_vm4, %v943_v61  ;;  %v936_v0 = vadd.f32 %v934_v52, %v932_v26  ;;  %v942_v15 = vmul.f32 %v1831_v32, %v908_v4  ;;  %v1038_v53 = vadd.f32 %v1036_v24, %v1034_v29  ;;  %v1092_v30 = vmul.f32 %v2291_v55, %v1766_v6  ;;  %v1621_v24 = vld [vmem:[%s1781_s25 + $0xa8] sm:$0xff] }
  0x78   : > { %v1041_v56 = vadd.f32 %v1039_v28, %v1037_v45  ;;  %v991_v63 = vmul.f32 %v908_v4, %v1794_v13  ;;  %v961_v34 = vsel %vm429_vm1, %v959_v38, %v958_v60  ;;  %v988_v39 = vadd.f32 %v986_v43, %v984_v16 }
  0x79   : > { %v940_v41 = vadd.f32 %v938_v23, %v936_v0  ;;  %v1042_v50 = vadd.f32 %v1040_v36, %v1038_v53  ;;  %v1044_v33 = vmul.f32 %v908_v4, %v1774_v9  ;;  %v962_v11 = vsel %vm403_vm0, %v961_v34, 0.0 }
  0x7a   : > { %v966_v49 = vsel %vm440_vm2, %v964_v22, %v965_v44  ;;  %v992_v48 = vadd.f32 %v990_v20, %v988_v39  ;;  %v994_v14 = vmul.f32 %v962_v11, %v1826_v31  ;;  %v998_v57 = vmul.f32 %v2249_v1, %v1809_v18 }
  0x7b   : > { %v944_v62 = vadd.f32 %v942_v15, %v940_v41  ;;  %v1002_v16 = vmul.f32 %v1831_v32, %v966_v49  ;;  %v1094_v40 = vadd.f32 %v1786_v10, %v1092_v30  ;;  %v1096_v59 = vmul.f32 %v962_v11, %v1772_v8  ;;  %v2339_v30 = vld [vmem:[%s1781_s25 + $0xb0] sm:$0xff] }
  0x7c   : > { %v996_v28 = vadd.f32 %v994_v14, %v992_v48  ;;  %v960_v21 = vsel %vm429_vm1, %v958_v60, %v959_v38  ;;  %v967_v27 = vsel %vm440_vm2, %v965_v44, %v964_v22  ;;  %v987_v51 = vmul.f32 %v899_v42, %v1792_v12 }
  0x7d   : > { %v1045_v20 = vadd.f32 %v1043_v25, %v1041_v56  ;;  %1615 = vst.msk [vmem:[%s1936_s7 + $0x78] sm:$0xff] %vm518_vm4, %v944_v62  ;;  %v1046_v45 = vadd.f32 %v1044_v33, %v1042_v50  ;;  %v1051_v46 = vmul.f32 %v966_v49, %v1794_v13  ;;  %v1100_v37 = vmul.f32 %v2249_v1, %v1758_v2  ;;  %v2356_v62 = vld [vmem:[%s2645_s4] ss:$0 sm:$0xff] }
  0x7e   : > { %v1000_v52 = vadd.f32 %v998_v57, %v996_v28  ;;  %v1104_v47 = vmul.f32 %v966_v49, %v1774_v9  ;;  %v989_v4 = vadd.f32 %v987_v51, %v985_v19  ;;  %v995_v23 = vmul.f32 %v960_v21, %v1826_v31 }
  0x7f   : > { %v1098_v60 = vadd.f32 %v1096_v59, %v1094_v40  ;;  %v969_v42 = vsel %vm406_vm3, %v967_v27, 0.0  ;;  %v1093_v25 = vmul.f32 %v1621_v24, %v1766_v6  ;;  %v1097_v61 = vmul.f32 %v960_v21, %v1772_v8 }
  0x80   : > { %v1004_v26 = vadd.f32 %v1002_v16, %v1000_v52  ;;  %v993_v29 = vadd.f32 %v991_v63, %v989_v4  ;;  %v999_v1 = vmul.f32 %v1617_v54, %v1809_v18  ;;  %v1019_v36 = vrot.slane %v2291_v55, 7 }
  0x81   : > { %v1095_v19 = vadd.f32 %v1786_v10, %v1093_v25  ;;  %v1101_v38 = vmul.f32 %v1617_v54, %v1758_v2  ;;  %v1020_v22 = vrot.slane %v1621_v24, 7  ;;  %v1025_v44 = vrot.slane %v2291_v55, 1 }
  0x82   : > { %1618 = vst.msk [vmem:[%s1936_s7 + $0x80] sm:$0xff] %vm518_vm4, %v1004_v26  ;;  %v997_v43 = vadd.f32 %v995_v23, %v993_v29  ;;  %v1003_v0 = vmul.f32 %v1831_v32, %v969_v42  ;;  %v1026_v15 = vrot.slane %v1621_v24, 1  ;;  %v1047_v53 = vmul.f32 %v962_v11, %v1792_v12 }
  0x83   : > { %v1102_v56 = vadd.f32 %v1100_v37, %v1098_v60  ;;  %v1099_v63 = vadd.f32 %v1097_v61, %v1095_v19  ;;  %v1022_v10 = vsel %vm429_vm1, %v1020_v22, %v1019_v36  ;;  %v1153_v54 = vmul.f32 %v2339_v30, %v1766_v6  ;;  %v2374_v60 = vld [vmem:[%s1781_s25 + $0xb8] sm:$0xff] }
  0x84   : > { %v1001_v34 = vadd.f32 %v999_v1, %v997_v43  ;;  %v1105_v39 = vmul.f32 %v969_v42, %v1774_v9  ;;  %v1023_v41 = vsel %vm403_vm0, %v1022_v10, 0.0  ;;  %v1049_v50 = vadd.f32 %v1047_v53, %v1045_v20 }
  0x85   : > { %v1103_v33 = vadd.f32 %v1101_v38, %v1099_v63  ;;  %v1027_v11 = vsel %vm440_vm2, %v1025_v44, %v1026_v15  ;;  %v1055_v49 = vmul.f32 %v1023_v41, %v1826_v31  ;;  %v1059_v48 = vmul.f32 %v2291_v55, %v1809_v18 }
  0x86   : > { %v1005_v14 = vadd.f32 %v1003_v0, %v1001_v34  ;;  %v1053_v57 = vadd.f32 %v1051_v46, %v1049_v50  ;;  %v1155_v16 = vadd.f32 %v2356_v62, %v1153_v54  ;;  %v1157_v40 = vmul.f32 %v1023_v41, %v1772_v8 }
  0x87   : > { %v1106_v59 = vadd.f32 %v1104_v47, %v1102_v56  ;;  %v1052_v28 = vmul.f32 %v969_v42, %v1794_v13  ;;  %v1063_v27 = vmul.f32 %v1831_v32, %v1027_v11  ;;  %v1161_v51 = vmul.f32 %v2291_v55, %v1758_v2  ;;  %v2398_v56 = vld [vmem:[%s2644_s3 + $0x8] ss:$0 sm:$0xff] }
  0x88   : > { %1619 = vst.msk [vmem:[%s1936_s7 + $0x88] sm:$0xff] %vm518_vm4, %v1005_v14  ;;  %v1057_v20 = vadd.f32 %v1055_v49, %v1053_v57  ;;  %v1021_v46 = vsel %vm429_vm1, %v1019_v36, %v1020_v22  ;;  %v1028_v37 = vsel %vm440_vm2, %v1026_v15, %v1025_v44  ;;  %v1048_v52 = vmul.f32 %v960_v21, %v1792_v12  ;;  %v2391_v15 = vld [vmem:[%s1781_s25 + $0xc0] sm:$0xff] }
  0x89   : > { %v1107_v4 = vadd.f32 %v1105_v39, %v1103_v33  ;;  %v1112_v47 = vmul.f32 %v1027_v11, %v1794_v13  ;;  %v1159_v23 = vadd.f32 %v1157_v40, %v1155_v16  ;;  %v1165_v32 = vmul.f32 %v1027_v11, %v1774_v9 }
  0x8a   : > { %v1061_v55 = vadd.f32 %v1059_v48, %v1057_v20  ;;  %v1050_v42 = vadd.f32 %v1048_v52, %v1046_v45  ;;  %v1056_v25 = vmul.f32 %v1021_v46, %v1826_v31  ;;  %v1154_v61 = vmul.f32 %v2374_v60, %v1766_v6 }
  0x8b   : > { %v1030_v21 = vsel %vm406_vm3, %v1028_v37, 0.0  ;;  %v1060_v26 = vmul.f32 %v1621_v24, %v1809_v18  ;;  %v1158_v29 = vmul.f32 %v1021_v46, %v1772_v8  ;;  %v1080_v1 = vrot.slane %v2339_v30, 7 }
  0x8c   : > { %v1065_v36 = vadd.f32 %v1063_v27, %v1061_v55  ;;  %v1054_v19 = vadd.f32 %v1052_v28, %v1050_v42  ;;  %v1156_v38 = vadd.f32 %v2356_v62, %v1154_v61  ;;  %v1162_v45 = vmul.f32 %v1621_v24, %v1758_v2 }
  0x8d   : > { %v1081_v22 = vrot.slane %v2374_v60, 7  ;;  %v1086_v44 = vrot.slane %v2339_v30, 1  ;;  %v1087_v43 = vrot.slane %v2374_v60, 1  ;;  %v1108_v0 = vmul.f32 %v1023_v41, %v1792_v12 }
  0x8e   : > { %1622 = vst.msk [vmem:[%s1936_s7 + $0x90] sm:$0xff] %vm518_vm4, %v1065_v36  ;;  %v1058_v53 = vadd.f32 %v1056_v25, %v1054_v19  ;;  %v1064_v24 = vmul.f32 %v2398_v56, %v1030_v21  ;;  %v1160_v63 = vadd.f32 %v1158_v29, %v1156_v38  ;;  %v1214_v10 = vmul.f32 %v2391_v15, %v1766_v6  ;;  %v1629_v29 = vld [vmem:[%s1781_s25 + $0xc8] sm:$0xff] }
  0x8f   : > { %v1163_v54 = vadd.f32 %v1161_v51, %v1159_v23  ;;  %v1113_v34 = vmul.f32 %v1030_v21, %v1794_v13  ;;  %v1083_v39 = vsel %vm429_vm1, %v1081_v22, %v1080_v1  ;;  %v1110_v41 = vadd.f32 %v1108_v0, %v1106_v59 }
  0x90   : > { %v1062_v50 = vadd.f32 %v1060_v26, %v1058_v53  ;;  %v1164_v33 = vadd.f32 %v1162_v45, %v1160_v63  ;;  %v1166_v11 = vmul.f32 %v1030_v21, %v1774_v9  ;;  %v1084_v49 = vsel %vm403_vm0, %v1083_v39, 0.0 }
  0x91   : > { %v1088_v48 = vsel %vm440_vm2, %v1086_v44, %v1087_v43  ;;  %v1114_v14 = vadd.f32 %v1112_v47, %v1110_v41  ;;  %v1116_v57 = vmul.f32 %v1084_v49, %v1826_v31  ;;  %v1120_v16 = vmul.f32 %v2339_v30, %v1809_v18 }
  0x92   : > { %v1066_v40 = vadd.f32 %v1064_v24, %v1062_v50  ;;  %v1124_v59 = vmul.f32 %v2398_v56, %v1088_v48  ;;  %v1216_v28 = vadd.f32 %v2356_v62, %v1214_v10  ;;  %v1218_v27 = vmul.f32 %v1084_v49, %v1772_v8  ;;  %v2446_v10 = vld [vmem:[%s1781_s25 + $0xd0] sm:$0xff] }
  0x93   : > { %v1118_v51 = vadd.f32 %v1116_v57, %v1114_v14  ;;  %v1082_v20 = vsel %vm429_vm1, %v1080_v1, %v1081_v22  ;;  %v1089_v37 = vsel %vm440_vm2, %v1087_v43, %v1086_v44  ;;  %v1109_v52 = vmul.f32 %v1021_v46, %v1792_v12 }
  0x94   : > { %v1167_v47 = vadd.f32 %v1165_v32, %v1163_v54  ;;  %1623 = vst.msk [vmem:[%s1936_s7 + $0x98] sm:$0xff] %vm518_vm4, %v1066_v40  ;;  %v1168_v23 = vadd.f32 %v1166_v11, %v1164_v33  ;;  %v1173_v55 = vmul.f32 %v1088_v48, %v1794_v13  ;;  %v1222_v42 = vmul.f32 %v2339_v30, %v1758_v2 }
  0x95   : > { %v1122_v25 = vadd.f32 %v1120_v16, %v1118_v51  ;;  %v1226_v61 = vmul.f32 %v1088_v48, %v1774_v9  ;;  %v1111_v21 = vadd.f32 %v1109_v52, %v1107_v4  ;;  %v1117_v26 = vmul.f32 %v1082_v20, %v1826_v31 }
  0x96   : > { %v1220_v1 = vadd.f32 %v1218_v27, %v1216_v28  ;;  %v1091_v46 = vsel %vm406_vm3, %v1089_v37, 0.0  ;;  %v1215_v32 = vmul.f32 %v1629_v29, %v1766_v6  ;;  %v1219_v36 = vmul.f32 %v1082_v20, %v1772_v8 }
  0x97   : > { %v1126_v19 = vadd.f32 %v1124_v59, %v1122_v25  ;;  %v1115_v38 = vadd.f32 %v1113_v34, %v1111_v21  ;;  %v1121_v30 = vmul.f32 %v2374_v60, %v1809_v18  ;;  %v1141_v45 = vrot.slane %v2391_v15, 7 }
  0x98   : > { %v1217_v4 = vadd.f32 %v2356_v62, %v1215_v32  ;;  %v1223_v22 = vmul.f32 %v2374_v60, %v1758_v2  ;;  %v1142_v44 = vrot.slane %v1629_v29, 7  ;;  %v1147_v43 = vrot.slane %v2391_v15, 1 }
  0x99   : > { %1626 = vst.msk [vmem:[%s1936_s7 + $0xa0] sm:$0xff] %vm518_vm4, %v1126_v19  ;;  %v1119_v0 = vadd.f32 %v1117_v26, %v1115_v38  ;;  %v1125_v53 = vmul.f32 %v2398_v56, %v1091_v46  ;;  %v1148_v24 = vrot.slane %v1629_v29, 1  ;;  %v1169_v63 = vmul.f32 %v1084_v49, %v1792_v12 }
  0x9a   : > { %v1224_v54 = vadd.f32 %v1222_v42, %v1220_v1  ;;  %v1221_v34 = vadd.f32 %v1219_v36, %v1217_v4  ;;  %v1144_v39 = vsel %vm429_vm1, %v1142_v44, %v1141_v45  ;;  %v1275_v60 = vmul.f32 %v2446_v10, %v1766_v6 }
  0x9b   : > { %v1123_v41 = vadd.f32 %v1121_v30, %v1119_v0  ;;  %v1227_v50 = vmul.f32 %v1091_v46, %v1774_v9  ;;  %v1145_v33 = vsel %vm403_vm0, %v1144_v39, 0.0  ;;  %v1171_v11 = vadd.f32 %v1169_v63, %v1167_v47  ;;  %v2493_v63 = vld [vmem:[%s1781_s25 + $0xe0] sm:$0xff] }
  0x9c   : > { %v1225_v48 = vadd.f32 %v1223_v22, %v1221_v34  ;;  %v1149_v49 = vsel %vm440_vm2, %v1147_v43, %v1148_v24  ;;  %v1177_v14 = vmul.f32 %v1145_v33, %v1826_v31  ;;  %v1181_v57 = vmul.f32 %v2391_v15, %v1809_v18 }
  0x9d   : > { %v1127_v16 = vadd.f32 %v1125_v53, %v1123_v41  ;;  %v1175_v40 = vadd.f32 %v1173_v55, %v1171_v11  ;;  %v1277_v59 = vadd.f32 %v2356_v62, %v1275_v60  ;;  %v1279_v28 = vmul.f32 %v1145_v33, %v1772_v8 }
  0x9e   : > { %v1228_v27 = vadd.f32 %v1226_v61, %v1224_v54  ;;  %v1174_v51 = vmul.f32 %v1091_v46, %v1794_v13  ;;  %v1185_v37 = vmul.f32 %v2398_v56, %v1149_v49  ;;  %v1283_v52 = vmul.f32 %v2391_v15, %v1758_v2  ;;  %v2476_v46 = vld [vmem:[%s1781_s25 + $0xd8] sm:$0xff] }
  0x9f   : > { %1627 = vst.msk [vmem:[%s1936_s7 + $0xa8] sm:$0xff] %vm518_vm4, %v1127_v16  ;;  %v1179_v47 = vadd.f32 %v1177_v14, %v1175_v40  ;;  %v1143_v42 = vsel %vm429_vm1, %v1141_v45, %v1142_v44  ;;  %v1150_v55 = vsel %vm440_vm2, %v1148_v24, %v1147_v43  ;;  %v1170_v25 = vmul.f32 %v1082_v20, %v1792_v12 }
  0xa0   : > { %v1229_v21 = vadd.f32 %v1227_v50, %v1225_v48  ;;  %v1234_v61 = vmul.f32 %v1149_v49, %v1794_v13  ;;  %v1281_v26 = vadd.f32 %v1279_v28, %v1277_v59  ;;  %v1287_v1 = vmul.f32 %v1149_v49, %v1774_v9 }
  0xa1   : > { %v1183_v15 = vadd.f32 %v1181_v57, %v1179_v47  ;;  %v1172_v32 = vadd.f32 %v1170_v25, %v1168_v23  ;;  %v1178_v36 = vmul.f32 %v1143_v42, %v1826_v31  ;;  %v1276_v19 = vmul.f32 %v2476_v46, %v1766_v6 }
  0xa2   : > { %v1152_v20 = vsel %vm406_vm3, %v1150_v55, 0.0  ;;  %v1182_v38 = vmul.f32 %v1629_v29, %v1809_v18  ;;  %v1280_v30 = vmul.f32 %v1143_v42, %v1772_v8  ;;  %v1202_v45 = vrot.slane %v2446_v10, 7 }
  0xa3   : > { %v1187_v4 = vadd.f32 %v1185_v37, %v1183_v15  ;;  %v1176_v22 = vadd.f32 %v1174_v51, %v1172_v32  ;;  %v1278_v44 = vadd.f32 %v2356_v62, %v1276_v19  ;;  %v1284_v23 = vmul.f32 %v1629_v29, %v1758_v2 }
  0xa4   : > { %v1203_v43 = vrot.slane %v2476_v46, 7  ;;  %v1208_v0 = vrot.slane %v2446_v10, 1  ;;  %v1209_v53 = vrot.slane %v2476_v46, 1  ;;  %v1230_v24 = vmul.f32 %v1145_v33, %v1792_v12 }
  0xa5   : > { %1630 = vst.msk [vmem:[%s1936_s7 + $0xb0] sm:$0xff] %vm518_vm4, %v1187_v4  ;;  %v1180_v54 = vadd.f32 %v1178_v36, %v1176_v22  ;;  %v1186_v34 = vmul.f32 %v2398_v56, %v1152_v20  ;;  %v1282_v39 = vadd.f32 %v1280_v30, %v1278_v44  ;;  %v1336_v60 = vmul.f32 %v2493_v63, %v1766_v6  ;;  %v1637_v30 = vld [vmem:[%s1781_s25 + $0xe8] sm:$0xff] }
  0xa6   : > { %v1285_v29 = vadd.f32 %v1283_v52, %v1281_v26  ;;  %v1288_v41 = vmul.f32 %v1152_v20, %v1774_v9  ;;  %v1205_v50 = vsel %vm429_vm1, %v1203_v43, %v1202_v45  ;;  %v1232_v11 = vadd.f32 %v1230_v24, %v1228_v27 }
  0xa7   : > { %v1184_v48 = vadd.f32 %v1182_v38, %v1180_v54  ;;  %v1206_v33 = vsel %vm403_vm0, %v1205_v50, 0.0  ;;  %v1210_v49 = vsel %vm440_vm2, %v1208_v0, %v1209_v53  ;;  %v1242_v14 = vmul.f32 %v2446_v10, %v1809_v18 }
  0xa8   : > { %v1286_v57 = vadd.f32 %v1284_v23, %v1282_v39  ;;  %v1236_v16 = vadd.f32 %v1234_v61, %v1232_v11  ;;  %v1238_v40 = vmul.f32 %v1206_v33, %v1826_v31  ;;  %v1338_v59 = vadd.f32 %v2356_v62, %v1336_v60 }
  0xa9   : > { %v1188_v28 = vadd.f32 %v1186_v34, %v1184_v48  ;;  %v1235_v27 = vmul.f32 %v1152_v20, %v1794_v13  ;;  %v1246_v51 = vmul.f32 %v2398_v56, %v1210_v49  ;;  %v1340_v37 = vmul.f32 %v1206_v33, %v1772_v8 }
  0xaa   : > { %v1240_v52 = vadd.f32 %v1238_v40, %v1236_v16  ;;  %v1204_v47 = vsel %vm429_vm1, %v1202_v45, %v1203_v43  ;;  %v1211_v55 = vsel %vm440_vm2, %v1209_v53, %v1208_v0  ;;  %v1231_v25 = vmul.f32 %v1143_v42, %v1792_v12  ;;  %v2553_v40 = vld [vmem:[%s1781_s25 + $0xf8] sm:$0xff] }
  0xab   : > { %v1289_v61 = vadd.f32 %v1287_v1, %v1285_v29  ;;  %1631 = vst.msk [vmem:[%s1936_s7 + $0xb8] sm:$0xff] %vm518_vm4, %v1188_v28  ;;  %v1295_v26 = vmul.f32 %v1210_v49, %v1794_v13  ;;  %v1342_v15 = vadd.f32 %v1340_v37, %v1338_v59  ;;  %v1344_v32 = vmul.f32 %v2446_v10, %v1758_v2 }
  0xac   : > { %v1290_v36 = vadd.f32 %v1288_v41, %v1286_v57  ;;  %v1244_v19 = vadd.f32 %v1242_v14, %v1240_v52  ;;  %v1233_v20 = vadd.f32 %v1231_v25, %v1229_v21  ;;  %v1239_v38 = vmul.f32 %v1204_v47, %v1826_v31 }
  0xad   : > { %v1348_v45 = vmul.f32 %v1210_v49, %v1774_v9  ;;  %v1213_v42 = vsel %vm406_vm3, %v1211_v55, 0.0  ;;  %v1337_v1 = vmul.f32 %v1637_v30, %v1766_v6  ;;  %v1341_v4 = vmul.f32 %v1204_v47, %v1772_v8 }
  0xae   : > { %v1248_v22 = vadd.f32 %v1246_v51, %v1244_v19  ;;  %v1237_v44 = vadd.f32 %v1235_v27, %v1233_v20  ;;  %v1243_v10 = vmul.f32 %v2476_v46, %v1809_v18  ;;  %v1263_v23 = vrot.slane %v2493_v63, 7 }
  0xaf   : > { %v1346_v21 = vadd.f32 %v1344_v32, %v1342_v15  ;;  %v1247_v43 = vmul.f32 %v2398_v56, %v1213_v42  ;;  %v1339_v0 = vadd.f32 %v2356_v62, %v1337_v1  ;;  %v1264_v53 = vrot.slane %v1637_v30, 7 }
  0xb0   : > { %1634 = vst.msk [vmem:[%s1936_s7 + $0xc0] sm:$0xff] %vm518_vm4, %v1248_v22  ;;  %v1241_v24 = vadd.f32 %v1239_v38, %v1237_v44  ;;  %v1269_v54 = vrot.slane %v2493_v63, 1  ;;  %v1270_v34 = vrot.slane %v1637_v30, 1  ;;  %v1291_v39 = vmul.f32 %v1206_v33, %v1792_v12 }
  0xb1   : > { %v1343_v60 = vadd.f32 %v1341_v4, %v1339_v0  ;;  %v1345_v29 = vmul.f32 %v2476_v46, %v1758_v2  ;;  %v1266_v41 = vsel %vm429_vm1, %v1264_v53, %v1263_v23  ;;  %v1292_v50 = vmul.f32 %v1204_v47, %v1792_v12  ;;  %v1640_v4 = vld [vmem:[%s1781_s25 + $0xf0] sm:$0xff] }
  0xb2   : > { %v1245_v11 = vadd.f32 %v1243_v10, %v1241_v24  ;;  %v1296_v48 = vmul.f32 %v1213_v42, %v1794_v13  ;;  %v1267_v49 = vsel %vm403_vm0, %v1266_v41, 0.0  ;;  %v1293_v14 = vadd.f32 %v1291_v39, %v1289_v61 }
  0xb3   : > { %v1350_v57 = vadd.f32 %v1348_v45, %v1346_v21  ;;  %v1349_v33 = vmul.f32 %v1213_v42, %v1774_v9  ;;  %v1299_v16 = vmul.f32 %v1267_v49, %v1826_v31  ;;  %v1303_v46 = vmul.f32 %v2493_v63, %v1809_v18 }
  0xb4   : > { %v1249_v59 = vadd.f32 %v1247_v43, %v1245_v11  ;;  %v1271_v28 = vsel %vm440_vm2, %v1269_v54, %v1270_v34  ;;  %v1297_v27 = vadd.f32 %v1295_v26, %v1293_v14  ;;  %v1265_v51 = vsel %vm429_vm1, %v1263_v23, %v1264_v53 }
  0xb5   : > { %v1347_v37 = vadd.f32 %v1345_v29, %v1343_v60  ;;  %v1272_v52 = vsel %vm440_vm2, %v1270_v34, %v1269_v54  ;;  %v1294_v47 = vadd.f32 %v1292_v50, %v1290_v36  ;;  %v1300_v55 = vmul.f32 %v1265_v51, %v1826_v31 }
  0xb6   : > { %1635 = vst.msk [vmem:[%s1936_s7 + $0xc8] sm:$0xff] %vm518_vm4, %v1249_v59  ;;  %v1301_v25 = vadd.f32 %v1299_v16, %v1297_v27  ;;  %v1307_v61 = vmul.f32 %v2398_v56, %v1271_v28  ;;  %v1356_v15 = vmul.f32 %v1271_v28, %v1794_v13  ;;  %v1397_v26 = vmul.f32 %v2553_v40, %v1766_v6 }
  0xb7   : > { %v1274_v32 = vsel %vm406_vm3, %v1272_v52, 0.0  ;;  %v1298_v19 = vadd.f32 %v1296_v48, %v1294_v47  ;;  %v1304_v20 = vmul.f32 %v1637_v30, %v1809_v18  ;;  %v1401_v36 = vmul.f32 %v1265_v51, %v1772_v8 }
  0xb8   : > { %v1305_v38 = vadd.f32 %v1303_v46, %v1301_v25  ;;  %v1308_v45 = vmul.f32 %v2398_v56, %v1274_v32  ;;  %v1399_v42 = vadd.f32 %v2356_v62, %v1397_v26  ;;  %v1405_v1 = vmul.f32 %v1637_v30, %v1758_v2 }
  0xb9   : > { %v1302_v22 = vadd.f32 %v1300_v55, %v1298_v19  ;;  %v1324_v44 = vrot.slane %v1640_v4, 7  ;;  %v1325_v10 = vrot.slane %v2553_v40, 7  ;;  %v1330_v23 = vrot.slane %v1640_v4, 1 }
  0xba   : > { %v1309_v21 = vadd.f32 %v1307_v61, %v1305_v38  ;;  %v1403_v43 = vadd.f32 %v1401_v36, %v1399_v42  ;;  %v1331_v0 = vrot.slane %v2553_v40, 1  ;;  %v1352_v53 = vmul.f32 %v1267_v49, %v1792_v12 }
  0xbb   : > { %v1306_v24 = vadd.f32 %v1304_v20, %v1302_v22  ;;  %v1409_v54 = vmul.f32 %v1274_v32, %v1774_v9  ;;  %v1327_v34 = vsel %vm429_vm1, %v1325_v10, %v1324_v44  ;;  %v1396_v30 = vmul.f32 %v1640_v4, %v1766_v6 }
  0xbc   : > { %1638 = vst.msk [vmem:[%s1936_s7 + $0xd0] sm:$0xff] %vm518_vm4, %v1309_v21  ;;  %v1400_v39 = vmul.f32 %v1267_v49, %v1772_v8  ;;  %v1407_v60 = vadd.f32 %v1405_v1, %v1403_v43  ;;  %v1328_v29 = vsel %vm403_vm0, %v1327_v34, 0.0  ;;  %v1354_v41 = vadd.f32 %v1352_v53, %v1350_v57 }
  0xbd   : > { %v1351_v50 = vadd.f32 %v1349_v33, %v1347_v37  ;;  %v1310_v11 = vadd.f32 %v1308_v45, %v1306_v24  ;;  %v1360_v48 = vmul.f32 %v1328_v29, %v1826_v31  ;;  %v1398_v14 = vadd.f32 %v2356_v62, %v1396_v30 }
  0xbe   : > { %v1357_v16 = vmul.f32 %v1274_v32, %v1794_v13  ;;  %v1332_v6 = vsel %vm440_vm2, %v1330_v23, %v1331_v0  ;;  %v1358_v46 = vadd.f32 %v1356_v15, %v1354_v41  ;;  %v1364_v59 = vmul.f32 %v1640_v4, %v1809_v18 }
  0xbf   : > { %1639 = vst.msk [vmem:[%s1936_s7 + $0xd8] sm:$0xff] %vm518_vm4, %v1310_v11  ;;  %v1411_v8 = vadd.f32 %v1409_v54, %v1407_v60  ;;  %v1326_v49 = vsel %vm429_vm1, %v1324_v44, %v1325_v10  ;;  %v1333_v57 = vsel %vm440_vm2, %v1331_v0, %v1330_v23  ;;  %v1353_v33 = vmul.f32 %v1265_v51, %v1792_v12 }
  0xc0   : > { %v1362_v62 = vadd.f32 %v1360_v48, %v1358_v46  ;;  %v1368_v27 = vmul.f32 %v2398_v56, %v1332_v6  ;;  %v1335_v37 = vsel %vm406_vm3, %v1333_v57, 0.0  ;;  %v1413_v52 = vmul.f32 %v1326_v49, %v1792_v12 }
  0xc1   : > { %v1355_v47 = vadd.f32 %v1353_v33, %v1351_v50  ;;  %v1361_v55 = vmul.f32 %v1326_v49, %v1826_v31  ;;  %v1417_v25 = vmul.f32 %v1335_v37, %v1794_v13  ;;  %v1402_v61 = vadd.f32 %v1400_v39, %v1398_v14 }
  0xc2   : > { %v1408_v3 = vmul.f32 %v1271_v28, %v1774_v9  ;;  %v1366_v15 = vadd.f32 %v1364_v59, %v1362_v62  ;;  %v1404_v51 = vmul.f32 %v2493_v63, %v1758_v2  ;;  %v1365_v35 = vmul.f32 %v2553_v40, %v1809_v18 }
  0xc3   : > { %v1359_v26 = vadd.f32 %v1357_v16, %v1355_v47  ;;  %v1415_v32 = vadd.f32 %v1413_v52, %v1411_v8  ;;  %v1421_v19 = vmul.f32 %v1826_v31, %v1764_v5  ;;  %v1412_v36 = vmul.f32 %v1328_v29, %v1792_v12 }
  0xc4   : > { %v1370_v20 = vadd.f32 %v1368_v27, %v1366_v15  ;;  %v1406_v38 = vadd.f32 %v1404_v51, %v1402_v61  ;;  %v1369_v9 = vmul.f32 %v2398_v56, %v1335_v37  ;;  %v1424_v28 = vmul.f32 0.0, %v1809_v18 }
  0xc5   : > { %v1363_v45 = vadd.f32 %v1361_v55, %v1359_v26  ;;  %v1419_v42 = vadd.f32 %v1417_v25, %v1415_v32  ;;  %v1416_v2 = vmul.f32 %v1332_v6, %v1794_v13  ;;  %v1429_v12 = vmul.f32 %v2398_v56, %v1880_v58 }
  0xc6   : > { %1642 = vst.msk [vmem:[%s1936_s7 + $0xe0] sm:$0xff] %vm518_vm4, %v1370_v20  ;;  %v1410_v63 = vadd.f32 %v1408_v3, %v1406_v38  ;;  %v1420_v4 = vmul.f32 %v1826_v31, %v1806_v17  ;;  %v1428_v13 = vmul.f32 %v2398_v56, %v1770_v7 }
  0xc7   : > { %v1367_v40 = vadd.f32 %v1365_v35, %v1363_v45  ;;  %v1423_v5 = vadd.f32 %v1421_v19, %v1419_v42 }
  0xc8   : > { %v1414_v1 = vadd.f32 %v1412_v36, %v1410_v63 }
  0xc9   : > { %v1371_v22 = vadd.f32 %v1369_v9, %v1367_v40  ;;  %v1427_v44 = vadd.f32 %v1424_v28, %v1423_v5 }
  0xca   : > { %v1418_v18 = vadd.f32 %v1416_v2, %v1414_v1 }
  0xcb   : > { %1643 = vst.msk [vmem:[%s1936_s7 + $0xe8] sm:$0xff] %vm518_vm4, %v1371_v22  ;;  %v1431_v10 = vadd.f32 %v1429_v12, %v1427_v44 }
  0xcc   : > { %v1422_v23 = vadd.f32 %v1420_v4, %v1418_v18 }
  0xcd   : > { %1645 = vst.msk [vmem:[%s1936_s7 + $0xf8] sm:$0xff] %vm518_vm4, %v1431_v10 }
  0xce   : > { %v1426_v21 = vadd.f32 %v1424_v28, %v1422_v23 }
  0xd0   : > { %v1430_v43 = vadd.f32 %v1428_v13, %v1426_v21 }
  0xd2   : > { %1644 = vst.msk [vmem:[%s1936_s7 + $0xf0] sm:$0xff] %vm518_vm4, %v1430_v43 }
  0xd3 PF: > { %s15_s20 = sadd.s32 1, %s1704_s20   ;;  %s2647_s18 = smov %s1700_s19 }
  0xd4   : > { %p12_p5 = scmp.ge.s32.totalorder %s15_s20, 4   ;;  %s2648_s19 = smov %s2650_s1 }
  0xd6   :  { %14 = sbr.rel (!%p12_p5) target bundleno = 2 (0x2), region = 106 }

</bundles_post_ra>
